<compile_context>
chip_gen: v5e
topology: v5e:2x2
jax: 0.10.0
libtpu: 0.0.40
codegen_flags: <defaults>
</compile_context>

<pallas_src>
import jax
import jax.numpy as jnp
import numpy as np
from jax.experimental import pallas as pl
from jax.experimental.pallas import tpu as pltpu

LANE = 128


def _round_up(x, m):
    return ((x + m - 1) // m) * m


def _tpu_caps():
    """(physical VMEM bytes per TensorCore, TensorCores per chip). Safe fallback."""
    vmem = 128 << 20
    cores = 1
    try:
        info = pltpu.get_tpu_info()
        vmem = int(getattr(info, "vmem_capacity_bytes", vmem))
        cores = int(getattr(info, "num_cores", getattr(info, "cores_per_chip", cores)))
    except Exception:
        pass
    if vmem <= (64 << 20):   # v7x: 64 MiB / TC, 2 TCs per chip
        cores = max(cores, 2)
    return vmem, cores


def _choose_tile_b(B, num_cores):
    """Rows per grid step: a multiple of 8 that divides B, or B itself."""
    if B % 8 != 0 or B <= 8:
        return B                       # full-extent block is always legal
    if num_cores >= 2:
        # >= 2 steps per core so each core can overlap its x-tile DMA with compute.
        steps = 2 * num_cores
        tb = max(8, (B // steps) // 8 * 8)
    else:
        # single TC: fewer, fatter steps (tile 512-2048 is at/near HBM roofline).
        tb = min(B, 2048) // 8 * 8
    while tb > 8 and B % tb != 0:
        tb -= 8
    return tb if (tb >= 8 and B % tb == 0) else B


def _vmem_tile_bytes(rows, cols, itemsize):
    """VMEM footprint of one (rows, cols) tile including lane/sublane padding."""
    sub = (8 * 4) // itemsize          # 8 sublanes for f32, 16 for packed bf16
    return _round_up(max(rows, 1), sub) * _round_up(max(cols, 1), LANE) * itemsize


def _make_mlp_kernel(n_inputs, n_rest, dropout_p, training):
    """Kernel for a fixed topology.

    Operand order: seed_ref, x_0..x_{n_inputs-1},
                   W0_0..W0_{n_inputs-1}, b0,
                   (W, b) for each remaining layer (interior relu layers, then final),
                   out_ref.
    n_rest = number of (W, b) pairs after the first layer (= len(hidden)-1 + 1 final).
    """
    keep_prob = 1.0 - float(dropout_p)
    use_dropout = bool(training) and dropout_p > 0.0
    if use_dropout:
        thresh = min(int(round(keep_prob * float(2 ** 32))), 2 ** 32 - 1)
        inv_keep = 1.0 / keep_prob

    def _dropout(h):  # inverted dropout, single compare + fused select/scale
        if not use_dropout:
            return h
        bits = pltpu.prng_random_bits(h.shape)
        if bits.dtype != jnp.uint32:
            bits = pltpu.bitcast(bits, jnp.uint32)
        return jnp.where(bits < jnp.uint32(thresh),
                         h * jnp.asarray(inv_keep, h.dtype),
                         jnp.asarray(0.0, h.dtype))

    def kernel(seed_ref, *refs):
        out_ref = refs[-1]
        x_refs = refs[:n_inputs]
        w0_refs = refs[n_inputs:2 * n_inputs]
        b0_ref = refs[2 * n_inputs]
        wb = refs[2 * n_inputs + 1:-1]

        if use_dropout:
            pltpu.prng_seed(seed_ref[0] + pl.program_id(0))   # per-tile stream

        # --- first hidden layer.  If the concat was fused away:
        #     cat(x, dim=1) @ W0 == sum_i x_i @ W0[rows_i]
        acc = jnp.dot(x_refs[0][...], w0_refs[0][...],
                      preferred_element_type=jnp.float32)
        for i in range(1, n_inputs):
            acc = acc + jnp.dot(x_refs[i][...], w0_refs[i][...],
                                preferred_element_type=jnp.float32)
        h = jnp.maximum(acc + b0_ref[...], 0.0)
        h = _dropout(h).astype(jnp.bfloat16)

        # --- remaining hidden layers (Linear + ReLU + dropout), statically unrolled
        for li in range(n_rest - 1):
            z = jnp.dot(h, wb[2 * li][...],
                        preferred_element_type=jnp.float32) + wb[2 * li + 1][...]
            z = jnp.maximum(z, 0.0)
            h = _dropout(z).astype(jnp.bfloat16)

        # --- final Linear (no activation / dropout), lane-dense store
        y = jnp.dot(h, wb[-2][...], preferred_element_type=jnp.float32) + wb[-1][...]
        out_ref[...] = y.astype(out_ref.dtype)

    return kernel


def prepare_concat_mlp_params(params, input_dims):
    """One-time padding / bf16 casting of PyTorch-layout parameters.

    params[i] = (W (in_features, out_features) f32, b (1, out_features) f32),
    i.e. y = x @ W + b.  Cache the returned dict and reuse it across calls.
    """
    input_dims = [int(d) for d in input_dims]
    in_dim = sum(input_dims)
    w0, b0 = params[0]
    assert int(w0.shape[0]) == in_dim
    h0 = int(w0.shape[1])

    # Fuse the concat only when every per-input dim is lane-aligned; otherwise
    # the wrapper will pre-concatenate the inputs and use a single W0.
    fuse_concat = len(input_dims) > 1 and all(d % LANE == 0 for d in input_dims)
    if fuse_concat:
        w0_chunks, off = [], 0
        for d in input_dims:
            w0_chunks.append(jnp.asarray(w0[off:off + d, :], jnp.bfloat16))
            off += d
    else:
        w0_chunks = [jnp.asarray(w0, jnp.bfloat16)]
    b0_p = jnp.asarray(b0, jnp.float32).reshape(1, h0)

    # Interior layers: true shapes, no padding (activations never leave VMEM).
    rest = []
    prev = h0
    for (w, b) in params[1:-1]:
        din, dout = int(w.shape[0]), int(w.shape[1])
        assert din == prev
        rest.append((jnp.asarray(w, jnp.bfloat16),
                     jnp.asarray(b, jnp.float32).reshape(1, dout)))
        prev = dout

    # Final layer: pad out_features to 128 lanes (zero cols / zero bias) so the
    # HBM store is unmasked and lane-dense.
    w_last, b_last = params[-1]
    din, out_dim = int(w_last.shape[0]), int(w_last.shape[1])
    assert din == prev
    out_pad = _round_up(out_dim, LANE)
    w_p = (jnp.zeros((din, out_pad), jnp.float32)
           .at[:, :out_dim].set(jnp.asarray(w_last, jnp.float32))
           .astype(jnp.bfloat16))
    b_p = (jnp.zeros((1, out_pad), jnp.float32)
           .at[:, :out_dim].set(jnp.asarray(b_last, jnp.float32).reshape(1, out_dim)))
    rest.append((w_p, b_p))

    return dict(input_dims=input_dims, fuse_concat=fuse_concat,
                w0_chunks=w0_chunks, b0=b0_p, rest=rest,
                out_dim=out_dim, out_pad=out_pad)


def concat_mlp_forward(xs, prepared, dropout_p=0.0, training=True, seed=0,
                       tile_b=None, out_dtype=jnp.float32, return_padded=False):
    """xs: list of (B, d_i) arrays.  prepared: dict from prepare_concat_mlp_params."""
    input_dims = prepared["input_dims"]
    B = int(xs[0].shape[0])
    out_pad = int(prepared["out_pad"])

    # --- inputs: pre-concatenate small / non-lane-aligned inputs (one DMA, one dot).
    if prepared["fuse_concat"]:
        x_ops = [x.astype(jnp.bfloat16) for x in xs]
        x_dims = list(input_dims)
    else:
        x_ops = [jnp.concatenate([x.astype(jnp.bfloat16) for x in xs], axis=1)]
        x_dims = [sum(input_dims)]
    n_inputs = len(x_ops)
    assert n_inputs == len(prepared["w0_chunks"])

    vmem_cap_bytes, num_cores = _tpu_caps()
    if tile_b is None:
        tile_b = _choose_tile_b(B, num_cores)
    assert B % tile_b == 0
    grid = (B // tile_b,)

    n_rest = len(prepared["rest"])
    kernel = _make_mlp_kernel(n_inputs, n_rest, dropout_p, training)

    # --- flat operands (index_maps receive (grid_idx, seed_ref)).
    flat = list(x_ops) + list(prepared["w0_chunks"]) + [prepared["b0"]]
    for (w_p, b_p) in prepared["rest"]:
        flat += [w_p, b_p]
    out_specs = pl.BlockSpec((tile_b, out_pad), lambda i, s: (i, 0))  # lane-dense
    seed_arr = jnp.array([seed], dtype=jnp.int32)

    # --- cost estimate (no transcendentals).
    flops = 0
    for w in prepared["w0_chunks"]:
        flops += 2 * B * int(w.shape[0]) * int(w.shape[1])
    for (w_p, _) in prepared["rest"]:
        flops += 2 * B * int(w_p.shape[0]) * int(w_p.shape[1])
    param_hbm_bytes = sum(int(a.nbytes) for a in flat[n_inputs:])
    in_bytes = sum(int(a.nbytes) for a in x_ops)
    out_bytes = B * out_pad * jnp.dtype(out_dtype).itemsize
    cost = pl.CostEstimate(flops=int(flops), transcendentals=0,
                           bytes_accessed=int(in_bytes + param_hbm_bytes + out_bytes))

    # --- VMEM budget including lane/sublane layout padding.
    x_tile_bytes = sum(_vmem_tile_bytes(tile_b, d, 2) for d in x_dims)
    param_vmem = 0
    for w in prepared["w0_chunks"]:
        param_vmem += _vmem_tile_bytes(int(w.shape[0]), int(w.shape[1]), 2)
    param_vmem += _vmem_tile_bytes(1, int(prepared["b0"].shape[1]), 4)
    for (w_p, b_p) in prepared["rest"]:
        param_vmem += _vmem_tile_bytes(int(w_p.shape[0]), int(w_p.shape[1]), 2)
        param_vmem += _vmem_tile_bytes(1, int(b_p.shape[1]), 4)
    out_tile_bytes = _vmem_tile_bytes(tile_b, out_pad, jnp.dtype(out_dtype).itemsize)
    widths = ([int(w.shape[1]) for w in prepared["w0_chunks"]]
              + [int(w.shape[1]) for (w, _) in prepared["rest"]])
    act_bytes = 3 * _round_up(tile_b, 8) * max(_round_up(w, LANE) for w in widths) * 4
    # Generation-aware ceiling: ~100 MiB on 128-MiB chips (v5e/v6e), ~56 MiB on v7x.
    vmem_ceiling = (100 << 20) if vmem_cap_bytes >= (96 << 20) else (56 << 20)

    def _run(single_buffer_weights):
        def const_spec(shape):
            if single_buffer_weights:
                return pl.BlockSpec(shape, lambda i, s: (0, 0),
                                    pipeline_mode=pl.Buffered(1))
            return pl.BlockSpec(shape, lambda i, s: (0, 0))

        in_specs = [pl.BlockSpec((tile_b, d), lambda i, s: (i, 0)) for d in x_dims]
        for w in prepared["w0_chunks"]:
            in_specs.append(const_spec(tuple(int(v) for v in w.shape)))
        in_specs.append(const_spec(tuple(int(v) for v in prepared["b0"].shape)))
        for (w_p, b_p) in prepared["rest"]:
            in_specs.append(const_spec(tuple(int(v) for v in w_p.shape)))
            in_specs.append(const_spec(tuple(int(v) for v in b_p.shape)))

        param_factor = 1 if single_buffer_weights else 2
        vmem_need = (2 * (x_tile_bytes + out_tile_bytes)
                     + param_factor * param_vmem + act_bytes + (2 << 20))
        vmem_limit = int(min(vmem_ceiling, max(16 << 20, vmem_need)))

        return pl.pallas_call(
            kernel,
            out_shape=jax.ShapeDtypeStruct((B, out_pad), out_dtype),
            grid_spec=pltpu.PrefetchScalarGridSpec(
                num_scalar_prefetch=1,
                grid=grid,
                in_specs=in_specs,
                out_specs=out_specs,
            ),
            compiler_params=pltpu.CompilerParams(
                dimension_semantics=("parallel",),
                vmem_limit_bytes=vmem_limit,
            ),
            cost_estimate=cost,
        )(seed_arr, *flat)

    try:
        out = _run(True)
    except Exception:
        # Fallback for jax versions that reject Buffered(1) weights.
        out = _run(False)

    if return_padded:
        return out                     # (B, out_pad) slab — lets the consumer fuse the slice
    return out[:, :prepared["out_dim"]]


def init_concat_mlp_params(config, key):
    """PyTorch nn.Linear-style uniform(-1/sqrt(fan_in), 1/sqrt(fan_in)) init."""
    input_dim = sum(config["input_dims"])
    dims = [input_dim] + list(config["hidden_list"]) + [config["out_dim"]]
    params = []
    for d_in, d_out in zip(dims[:-1], dims[1:]):
        key, kw, kb = jax.random.split(key, 3)
        bound = 1.0 / np.sqrt(d_in)
        w = jax.random.uniform(kw, (d_in, d_out), jnp.float32, -bound, bound)
        b = jax.random.uniform(kb, (1, d_out), jnp.float32, -bound, bound)
        params.append((w, b))
    return params


def reference_forward(xs, params):
    """Matched-precision pure-JAX reference (bf16 operands, f32 accumulation),
    dropout disabled."""
    x = jnp.concatenate([a.astype(jnp.bfloat16) for a in xs], axis=1)
    for (w, b) in params[:-1]:
        z = jnp.dot(x, w.astype(jnp.bfloat16), preferred_element_type=jnp.float32) + b
        x = jnp.maximum(z, 0.0).astype(jnp.bfloat16)
    w, b = params[-1]
    return jnp.dot(x, w.astype(jnp.bfloat16), preferred_element_type=jnp.float32) + b


if __name__ == "__main__":
    config = {
        "input_dims": [12, 20],     # torch.cat(dim=1) -> input_dim = 32
        "hidden_list": [32, 32],
        "out_dim": 16,
        "dropout": 0.0,             # deterministic path for verification
    }
    B = 256

    key = jax.random.PRNGKey(0)
    key, k1, k2, kp = jax.random.split(key, 4)
    xs = [
        jax.random.normal(k1, (B, config["input_dims"][0]), jnp.float32),
        jax.random.normal(k2, (B, config["input_dims"][1]), jnp.float32),
    ]
    params = init_concat_mlp_params(config, kp)

    # One-time parameter prep (pad final layer, cast to bf16); cache and reuse.
    prepared = prepare_concat_mlp_params(params, config["input_dims"])

    # TODO(synk): PyTorch's F.dropout RNG stream cannot be reproduced bit-exactly;
    # the kernel implements equivalent inverted dropout when training and dropout_p > 0.
    out = concat_mlp_forward(xs, prepared, dropout_p=config["dropout"],
                             training=False, seed=0)
    out = jax.block_until_ready(out)
    assert out.shape == (B, config["out_dim"])

    ref = reference_forward(xs, params)
    np.testing.assert_allclose(np.asarray(out), np.asarray(ref, dtype=np.float32),
                               rtol=2e-2, atol=2e-2)

    print("KERNEL_OK")
</pallas_src>

<mosaic_0001>
module attributes {stable_mosaic.version = 11 : i64} {
  func.func @kernel(%arg0: i32, %arg1: memref<1xi32, #tpu.memory_space<smem>>, %arg2: memref<256x32xbf16, #tpu.memory_space<vmem>>, %arg3: memref<32x32xbf16, #tpu.memory_space<vmem>>, %arg4: memref<1x32xf32, #tpu.memory_space<vmem>>, %arg5: memref<32x32xbf16, #tpu.memory_space<vmem>>, %arg6: memref<1x32xf32, #tpu.memory_space<vmem>>, %arg7: memref<32x128xbf16, #tpu.memory_space<vmem>>, %arg8: memref<1x128xf32, #tpu.memory_space<vmem>>, %arg9: memref<256x128xf32, #tpu.memory_space<vmem>>) attributes {dimension_semantics = [#tpu.dimension_semantics<parallel>], iteration_bounds = array<i64: 1>, scalar_prefetch = 1 : i64, scratch_operands = 0 : i64, tpu.core_type = #tpu.core_type<tc>, window_params = [{transform_indices = @transform_0, window_bounds = array<i64: 256, 32>}, {pipeline_mode = #tpu.pipeline_mode<synchronous>, transform_indices = @transform_1, window_bounds = array<i64: 32, 32>}, {pipeline_mode = #tpu.pipeline_mode<synchronous>, transform_indices = @transform_2, window_bounds = array<i64: 1, 32>}, {pipeline_mode = #tpu.pipeline_mode<synchronous>, transform_indices = @transform_3, window_bounds = array<i64: 32, 32>}, {pipeline_mode = #tpu.pipeline_mode<synchronous>, transform_indices = @transform_4, window_bounds = array<i64: 1, 32>}, {pipeline_mode = #tpu.pipeline_mode<synchronous>, transform_indices = @transform_5, window_bounds = array<i64: 32, 128>}, {pipeline_mode = #tpu.pipeline_mode<synchronous>, transform_indices = @transform_6, window_bounds = array<i64: 1, 128>}, {transform_indices = @transform_7, window_bounds = array<i64: 256, 128>}]} {
    %c0 = arith.constant 0 : index
    %c0_0 = arith.constant 0 : index
    %0 = vector.load %arg2[%c0, %c0_0] : memref<256x32xbf16, #tpu.memory_space<vmem>>, vector<256x32xbf16>
    %c0_1 = arith.constant 0 : index
    %c0_2 = arith.constant 0 : index
    %1 = vector.load %arg3[%c0_1, %c0_2] : memref<32x32xbf16, #tpu.memory_space<vmem>>, vector<32x32xbf16>
    %cst = arith.constant dense<0.000000e+00> : vector<256x32xf32>
    %2 = tpu.matmul %0, %1, %cst {dimension_numbers = #tpu.dot_dimension_numbers<[1], [0], [0], [1], [0, 0, 1, 1], [], []>} : vector<256x32xbf16>, vector<32x32xbf16>, vector<256x32xf32> -> vector<256x32xf32>
    %c0_3 = arith.constant 0 : index
    %c0_4 = arith.constant 0 : index
    %3 = vector.load %arg4[%c0_3, %c0_4] : memref<1x32xf32, #tpu.memory_space<vmem>>, vector<1x32xf32>
    %4 = vector.broadcast %3 : vector<1x32xf32> to vector<256x32xf32>
    %5 = arith.addf %2, %4 : vector<256x32xf32>
    %cst_5 = arith.constant 0.000000e+00 : f32
    %6 = vector.broadcast %cst_5 : f32 to vector<256x32xf32>
    %7 = arith.maximumf %5, %6 : vector<256x32xf32>
    %8 = arith.truncf %7 : vector<256x32xf32> to vector<256x32xbf16>
    %c0_6 = arith.constant 0 : index
    %c0_7 = arith.constant 0 : index
    %9 = vector.load %arg5[%c0_6, %c0_7] : memref<32x32xbf16, #tpu.memory_space<vmem>>, vector<32x32xbf16>
    %cst_8 = arith.constant dense<0.000000e+00> : vector<256x32xf32>
    %10 = tpu.matmul %8, %9, %cst_8 {dimension_numbers = #tpu.dot_dimension_numbers<[1], [0], [0], [1], [0, 0, 1, 1], [], []>} : vector<256x32xbf16>, vector<32x32xbf16>, vector<256x32xf32> -> vector<256x32xf32>
    %c0_9 = arith.constant 0 : index
    %c0_10 = arith.constant 0 : index
    %11 = vector.load %arg6[%c0_9, %c0_10] : memref<1x32xf32, #tpu.memory_space<vmem>>, vector<1x32xf32>
    %12 = vector.broadcast %11 : vector<1x32xf32> to vector<256x32xf32>
    %13 = arith.addf %10, %12 : vector<256x32xf32>
    %cst_11 = arith.constant 0.000000e+00 : f32
    %14 = vector.broadcast %cst_11 : f32 to vector<256x32xf32>
    %15 = arith.maximumf %13, %14 : vector<256x32xf32>
    %16 = arith.truncf %15 : vector<256x32xf32> to vector<256x32xbf16>
    %c0_12 = arith.constant 0 : index
    %c0_13 = arith.constant 0 : index
    %17 = vector.load %arg7[%c0_12, %c0_13] : memref<32x128xbf16, #tpu.memory_space<vmem>>, vector<32x128xbf16>
    %cst_14 = arith.constant dense<0.000000e+00> : vector<256x128xf32>
    %18 = tpu.matmul %16, %17, %cst_14 {dimension_numbers = #tpu.dot_dimension_numbers<[1], [0], [0], [1], [0, 0, 1, 1], [], []>} : vector<256x32xbf16>, vector<32x128xbf16>, vector<256x128xf32> -> vector<256x128xf32>
    %c0_15 = arith.constant 0 : index
    %c0_16 = arith.constant 0 : index
    %19 = vector.load %arg8[%c0_15, %c0_16] : memref<1x128xf32, #tpu.memory_space<vmem>>, vector<1x128xf32>
    %20 = vector.broadcast %19 : vector<1x128xf32> to vector<256x128xf32>
    %21 = arith.addf %18, %20 : vector<256x128xf32>
    %c0_17 = arith.constant 0 : index
    %c0_18 = arith.constant 0 : index
    %22 = vector.load %arg9[%c0_17, %c0_18] : memref<256x128xf32, #tpu.memory_space<vmem>>, vector<256x128xf32>
    tpu.vector_store %arg9[%c0_17, %c0_18], %21 {strides = array<i32>} : memref<256x128xf32, #tpu.memory_space<vmem>>, vector<256x128xf32>,
    return
  }
  func.func @transform_0(%arg0: i32, %arg1: memref<1xi32, #tpu.memory_space<smem>>) -> (i32, i32) {
    %c0_i32 = arith.constant 0 : i32
    %c0_i32_0 = arith.constant 0 : i32
    return %arg0, %c0_i32 : i32, i32
  }
  func.func @transform_1(%arg0: i32, %arg1: memref<1xi32, #tpu.memory_space<smem>>) -> (i32, i32) {
    %c0_i32 = arith.constant 0 : i32
    %c0_i32_0 = arith.constant 0 : i32
    %c0_i32_1 = arith.constant 0 : i32
    return %c0_i32, %c0_i32_0 : i32, i32
  }
  func.func @transform_2(%arg0: i32, %arg1: memref<1xi32, #tpu.memory_space<smem>>) -> (i32, i32) {
    %c0_i32 = arith.constant 0 : i32
    %c0_i32_0 = arith.constant 0 : i32
    %c0_i32_1 = arith.constant 0 : i32
    return %c0_i32, %c0_i32_0 : i32, i32
  }
  func.func @transform_3(%arg0: i32, %arg1: memref<1xi32, #tpu.memory_space<smem>>) -> (i32, i32) {
    %c0_i32 = arith.constant 0 : i32
    %c0_i32_0 = arith.constant 0 : i32
    %c0_i32_1 = arith.constant 0 : i32
    return %c0_i32, %c0_i32_0 : i32, i32
  }
  func.func @transform_4(%arg0: i32, %arg1: memref<1xi32, #tpu.memory_space<smem>>) -> (i32, i32) {
    %c0_i32 = arith.constant 0 : i32
    %c0_i32_0 = arith.constant 0 : i32
    %c0_i32_1 = arith.constant 0 : i32
    return %c0_i32, %c0_i32_0 : i32, i32
  }
  func.func @transform_5(%arg0: i32, %arg1: memref<1xi32, #tpu.memory_space<smem>>) -> (i32, i32) {
    %c0_i32 = arith.constant 0 : i32
    %c0_i32_0 = arith.constant 0 : i32
    %c0_i32_1 = arith.constant 0 : i32
    return %c0_i32, %c0_i32_0 : i32, i32
  }
  func.func @transform_6(%arg0: i32, %arg1: memref<1xi32, #tpu.memory_space<smem>>) -> (i32, i32) {
    %c0_i32 = arith.constant 0 : i32
    %c0_i32_0 = arith.constant 0 : i32
    %c0_i32_1 = arith.constant 0 : i32
    return %c0_i32, %c0_i32_0 : i32, i32
  }
  func.func @transform_7(%arg0: i32, %arg1: memref<1xi32, #tpu.memory_space<smem>>) -> (i32, i32) {
    %c0_i32 = arith.constant 0 : i32
    %c0_i32_0 = arith.constant 0 : i32
    return %arg0, %c0_i32 : i32, i32
  }
}

module attributes {stable_mosaic.version = 11 : i64} {
  func.func @kernel(%arg0: i32, %arg1: memref<1xi32, #tpu.memory_space<smem>>, %arg2: memref<256x32xbf16, #tpu.memory_space<vmem>>, %arg3: memref<32x32xbf16, #tpu.memory_space<vmem>>, %arg4: memref<1x32xf32, #tpu.memory_space<vmem>>, %arg5: memref<32x32xbf16, #tpu.memory_space<vmem>>, %arg6: memref<1x32xf32, #tpu.memory_space<vmem>>, %arg7: memref<32x128xbf16, #tpu.memory_space<vmem>>, %arg8: memref<1x128xf32, #tpu.memory_space<vmem>>, %arg9: memref<256x128xf32, #tpu.memory_space<vmem>>) attributes {dimension_semantics = [#tpu.dimension_semantics<parallel>], iteration_bounds = array<i64: 1>, scalar_prefetch = 1 : i64, scratch_operands = 0 : i64, tpu.core_type = #tpu.core_type<tc>, window_params = [{transform_indices = @transform_0, window_bounds = array<i64: 256, 32>}, {pipeline_mode = #tpu.pipeline_mode<synchronous>, transform_indices = @transform_1, window_bounds = array<i64: 32, 32>}, {pipeline_mode = #tpu.pipeline_mode<synchronous>, transform_indices = @transform_2, window_bounds = array<i64: 1, 32>}, {pipeline_mode = #tpu.pipeline_mode<synchronous>, transform_indices = @transform_3, window_bounds = array<i64: 32, 32>}, {pipeline_mode = #tpu.pipeline_mode<synchronous>, transform_indices = @transform_4, window_bounds = array<i64: 1, 32>}, {pipeline_mode = #tpu.pipeline_mode<synchronous>, transform_indices = @transform_5, window_bounds = array<i64: 32, 128>}, {pipeline_mode = #tpu.pipeline_mode<synchronous>, transform_indices = @transform_6, window_bounds = array<i64: 1, 128>}, {transform_indices = @transform_7, window_bounds = array<i64: 256, 128>}]} {
    %c0 = arith.constant 0 : index
    %c0_0 = arith.constant 0 : index
    %0 = vector.load %arg2[%c0, %c0_0] : memref<256x32xbf16, #tpu.memory_space<vmem>>, vector<256x32xbf16>
    %c0_1 = arith.constant 0 : index
    %c0_2 = arith.constant 0 : index
    %1 = vector.load %arg3[%c0_1, %c0_2] : memref<32x32xbf16, #tpu.memory_space<vmem>>, vector<32x32xbf16>
    %cst = arith.constant dense<0.000000e+00> : vector<256x32xf32>
    %2 = tpu.matmul %0, %1, %cst {dimension_numbers = #tpu.dot_dimension_numbers<[1], [0], [0], [1], [0, 0, 1, 1], [], []>} : vector<256x32xbf16>, vector<32x32xbf16>, vector<256x32xf32> -> vector<256x32xf32>
    %c0_3 = arith.constant 0 : index
    %c0_4 = arith.constant 0 : index
    %3 = vector.load %arg4[%c0_3, %c0_4] : memref<1x32xf32, #tpu.memory_space<vmem>>, vector<1x32xf32>
    %4 = vector.broadcast %3 : vector<1x32xf32> to vector<256x32xf32>
    %5 = arith.addf %2, %4 : vector<256x32xf32>
    %cst_5 = arith.constant 0.000000e+00 : f32
    %6 = vector.broadcast %cst_5 : f32 to vector<256x32xf32>
    %7 = arith.maximumf %5, %6 : vector<256x32xf32>
    %8 = arith.truncf %7 : vector<256x32xf32> to vector<256x32xbf16>
    %c0_6 = arith.constant 0 : index
    %c0_7 = arith.constant 0 : index
    %9 = vector.load %arg5[%c0_6, %c0_7] : memref<32x32xbf16, #tpu.memory_space<vmem>>, vector<32x32xbf16>
    %cst_8 = arith.constant dense<0.000000e+00> : vector<256x32xf32>
    %10 = tpu.matmul %8, %9, %cst_8 {dimension_numbers = #tpu.dot_dimension_numbers<[1], [0], [0], [1], [0, 0, 1, 1], [], []>} : vector<256x32xbf16>, vector<32x32xbf16>, vector<256x32xf32> -> vector<256x32xf32>
    %c0_9 = arith.constant 0 : index
    %c0_10 = arith.constant 0 : index
    %11 = vector.load %arg6[%c0_9, %c0_10] : memref<1x32xf32, #tpu.memory_space<vmem>>, vector<1x32xf32>
    %12 = vector.broadcast %11 : vector<1x32xf32> to vector<256x32xf32>
    %13 = arith.addf %10, %12 : vector<256x32xf32>
    %cst_11 = arith.constant 0.000000e+00 : f32
    %14 = vector.broadcast %cst_11 : f32 to vector<256x32xf32>
    %15 = arith.maximumf %13, %14 : vector<256x32xf32>
    %16 = arith.truncf %15 : vector<256x32xf32> to vector<256x32xbf16>
    %c0_12 = arith.constant 0 : index
    %c0_13 = arith.constant 0 : index
    %17 = vector.load %arg7[%c0_12, %c0_13] : memref<32x128xbf16, #tpu.memory_space<vmem>>, vector<32x128xbf16>
    %cst_14 = arith.constant dense<0.000000e+00> : vector<256x128xf32>
    %18 = tpu.matmul %16, %17, %cst_14 {dimension_numbers = #tpu.dot_dimension_numbers<[1], [0], [0], [1], [0, 0, 1, 1], [], []>} : vector<256x32xbf16>, vector<32x128xbf16>, vector<256x128xf32> -> vector<256x128xf32>
    %c0_15 = arith.constant 0 : index
    %c0_16 = arith.constant 0 : index
    %19 = vector.load %arg8[%c0_15, %c0_16] : memref<1x128xf32, #tpu.memory_space<vmem>>, vector<1x128xf32>
    %20 = vector.broadcast %19 : vector<1x128xf32> to vector<256x128xf32>
    %21 = arith.addf %18, %20 : vector<256x128xf32>
    %c0_17 = arith.constant 0 : index
    %c0_18 = arith.constant 0 : index
    %22 = vector.load %arg9[%c0_17, %c0_18] : memref<256x128xf32, #tpu.memory_space<vmem>>, vector<256x128xf32>
    tpu.vector_store %arg9[%c0_17, %c0_18], %21 {strides = array<i32>} : memref<256x128xf32, #tpu.memory_space<vmem>>, vector<256x128xf32>,
    return
  }
  func.func @transform_0(%arg0: i32, %arg1: memref<1xi32, #tpu.memory_space<smem>>) -> (i32, i32) {
    %c0_i32 = arith.constant 0 : i32
    %c0_i32_0 = arith.constant 0 : i32
    return %arg0, %c0_i32 : i32, i32
  }
  func.func @transform_1(%arg0: i32, %arg1: memref<1xi32, #tpu.memory_space<smem>>) -> (i32, i32) {
    %c0_i32 = arith.constant 0 : i32
    %c0_i32_0 = arith.constant 0 : i32
    %c0_i32_1 = arith.constant 0 : i32
    return %c0_i32, %c0_i32_0 : i32, i32
  }
  func.func @transform_2(%arg0: i32, %arg1: memref<1xi32, #tpu.memory_space<smem>>) -> (i32, i32) {
    %c0_i32 = arith.constant 0 : i32
    %c0_i32_0 = arith.constant 0 : i32
    %c0_i32_1 = arith.constant 0 : i32
    return %c0_i32, %c0_i32_0 : i32, i32
  }
  func.func @transform_3(%arg0: i32, %arg1: memref<1xi32, #tpu.memory_space<smem>>) -> (i32, i32) {
    %c0_i32 = arith.constant 0 : i32
    %c0_i32_0 = arith.constant 0 : i32
    %c0_i32_1 = arith.constant 0 : i32
    return %c0_i32, %c0_i32_0 : i32, i32
  }
  func.func @transform_4(%arg0: i32, %arg1: memref<1xi32, #tpu.memory_space<smem>>) -> (i32, i32) {
    %c0_i32 = arith.constant 0 : i32
    %c0_i32_0 = arith.constant 0 : i32
    %c0_i32_1 = arith.constant 0 : i32
    return %c0_i32, %c0_i32_0 : i32, i32
  }
  func.func @transform_5(%arg0: i32, %arg1: memref<1xi32, #tpu.memory_space<smem>>) -> (i32, i32) {
    %c0_i32 = arith.constant 0 : i32
    %c0_i32_0 = arith.constant 0 : i32
    %c0_i32_1 = arith.constant 0 : i32
    return %c0_i32, %c0_i32_0 : i32, i32
  }
  func.func @transform_6(%arg0: i32, %arg1: memref<1xi32, #tpu.memory_space<smem>>) -> (i32, i32) {
    %c0_i32 = arith.constant 0 : i32
    %c0_i32_0 = arith.constant 0 : i32
    %c0_i32_1 = arith.constant 0 : i32
    return %c0_i32, %c0_i32_0 : i32, i32
  }
  func.func @transform_7(%arg0: i32, %arg1: memref<1xi32, #tpu.memory_space<smem>>) -> (i32, i32) {
    %c0_i32 = arith.constant 0 : i32
    %c0_i32_0 = arith.constant 0 : i32
    return %arg0, %c0_i32 : i32, i32
  }
}

</mosaic_0001>

<bundles_post_ra>
// kernel: tpu_custom_call.1
= control target key start
LH: loop header
LB: loop body
LE: loop exit
PB: predicated region body
PF: predicated region fallthrough
CT: control target
= control target key end

     0   :  { %s1232_s0 = inlined_call_operand.<no memory space> [shape: s32[1], index: 0, kind: input, shape index: {}]   ;;  %s1233_s1 = inlined_call_operand.vmem [shape: bf16[256,32], index: 1, kind: input, shape index: {}]   ;;  %s1234_s2 = inlined_call_operand.vmem [shape: bf16[32,32], index: 2, kind: input, shape index: {}]   ;;  %s1235_s3 = inlined_call_operand.vmem [shape: f32[1,32], index: 3, kind: input, shape index: {}]   ;;  %s1236_s4 = inlined_call_operand.vmem [shape: bf16[32,32], index: 4, kind: input, shape index: {}]   ;;  %s1237_s5 = inlined_call_operand.vmem [shape: f32[1,32], index: 5, kind: input, shape index: {}]   ;;  %s1238_s6 = inlined_call_operand.vmem [shape: bf16[32,128], index: 6, kind: input, shape index: {}]   ;;  %s1239_s7 = inlined_call_operand.vmem [shape: f32[1,128], index: 7, kind: input, shape index: {}]   ;;  %s1240_s8 = inlined_call_operand.hbm [shape: f32[256,128], index: 8, kind: output, shape index: {}]  }
   0x1   :  { %v913_v0 = vld [vmem:[%s1234_s2 + $0x8] sm:$0xff]  ;;  %v912_v1 = vld [vmem:[%s1234_s2] sm:$0xff] }
   0x2   :  { %217 = vmatpush.bf16.msra.mxu0 %v913_v0  ;;  %918 = vmatpush.bf16.msra.mxu3 %v913_v0 }
   0x3   :  { %14 = vsyncpa [#allocation5], 0  ;;  %v896_v2 = vld [vmem:[%s1233_s1] sm:$0xff]  ;;  %vm162_vm0 = vcmask 261120   ;;  %v897_v3 = vld [vmem:[%s1233_s1 + $0x8] sm:$0xff]  ;;  %s748_s26 = sshll.u32 %s1240_s8, 4  ;;  %s749_s26 = int_to_ptr.hbm [resolvable:$true] %s748_s26 }
   0x4   :  { %v898_v4 = vld [vmem:[%s1233_s1 + $0x10] sm:$0xff]  ;;  %v899_v5 = vld [vmem:[%s1233_s1 + $0x18] sm:$0xff]  ;;  %v908_v6 = vld [vmem:[%s1233_s1 + $0x60] sm:$0xff]  ;;  %s957_s27 = smov 128   ;;  %s958_s28 = smov 8  }
   0x5   :  { %v900_v7 = vld [vmem:[%s1233_s1 + $0x20] sm:$0xff]  ;;  %v909_v8 = vld [vmem:[%s1233_s1 + $0x68] sm:$0xff]  ;;  %v910_v10 = vld [vmem:[%s1233_s1 + $0x70] sm:$0xff] }
   0x6   :  { %218 = vmatpush.bf16.msra.mxu0 %v912_v1  ;;  %919 = vmatpush.bf16.msra.mxu3 %v912_v1  ;;  %v901_v9 = vld [vmem:[%s1233_s1 + $0x28] sm:$0xff]  ;;  %v902_v11 = vld [vmem:[%s1233_s1 + $0x30] sm:$0xff]  ;;  %v914_v13 = vld [vmem:[%s1236_s4] sm:$0xff] }
   0x7   :  { %v915_v12 = vld [vmem:[%s1236_s4 + $0x8] sm:$0xff]  ;;  %v911_v14 = vld [vmem:[%s1233_s1 + $0x78] sm:$0xff]  ;;  %v904_v16 = vld [vmem:[%s1233_s1 + $0x40] sm:$0xff] }
   0x8   :  { %422 = vmatpush.bf16.msra.mxu1 %v915_v12  ;;  %v903_v15 = vld [vmem:[%s1233_s1 + $0x38] sm:$0xff]  ;;  %v1070_v18 = vld [vmem:[%s1235_s3] ss:$0 sm:$0xff]  ;;  %v905_v25 = vld [vmem:[%s1233_s1 + $0x48] sm:$0xff] }
   0x9   :  { %832 = vmatmul.msk.bf16.vlgmr.msra.gmra.mxu0 %vm162_vm0, %v896_v2  ;;  %844 = vmatmul.msk.bf16.vlgmr.msra.gmra.mxu3 %vm162_vm0, %v908_v6  ;;  %v906_v33 = vld [vmem:[%s1233_s1 + $0x50] sm:$0xff]  ;;  %v907_v41 = vld [vmem:[%s1233_s1 + $0x58] sm:$0xff] }
   0xa   :  { %920 = vmatpush.bf16.msrb.mxu3 %v915_v12 }
   0xc   :  { %423 = vmatpush.bf16.msra.mxu1 %v914_v13 }
   0xe   :  { %921 = vmatpush.bf16.msrb.mxu3 %v914_v13 }
  0x19   :  { %833 = vmatmul.msk.bf16.gmra.mxu0 %vm162_vm0, %v897_v3  ;;  %845 = vmatmul.msk.bf16.gmra.mxu3 %vm162_vm0, %v909_v8 }
  0x29   :  { %834 = vmatmul.msk.bf16.gmra.mxu0 %vm162_vm0, %v898_v4  ;;  %846 = vmatmul.msk.bf16.gmra.mxu3 %vm162_vm0, %v910_v10 }
  0x39   :  { %835 = vmatmul.msk.bf16.gmra.mxu0 %vm162_vm0, %v899_v5  ;;  %847 = vmatmul.msk.bf16.gmra.mxu3 %vm162_vm0, %v911_v14 }
  0x49   :  { %836 = vmatmul.msk.bf16.gmra.mxu0 %vm162_vm0, %v900_v7 }
  0x59   :  { %837 = vmatmul.msk.bf16.gmra.mxu0 %vm162_vm0, %v901_v9 }
  0x69   :  { %838 = vmatmul.msk.bf16.gmra.mxu0 %vm162_vm0, %v902_v11 }
  0x79   :  { %839 = vmatmul.msk.bf16.gmra.mxu0 %vm162_vm0, %v903_v15 }
  0x86   :  { %v220_v17 = vpop.f32.mrf.mxu0 }
  0x87   :  { %v221_v19 = vadd.f32 %v1070_v18, %v220_v17 }
  0x89   :  { %840 = vmatmul.msk.bf16.gmra.mxu0 %vm162_vm0, %v904_v16  ;;  %v300_v22 = vmax.f32 %v221_v19, 0.0 }
  0x8c   :  { %v280_v50 = vpop.f32.mrf.mxu3 }
  0x8d   :  { %v281_v52 = vadd.f32 %v1070_v18, %v280_v50 }
  0x8e   :  { %v222_v20 = vpop.f32.mrf.mxu0 }
  0x8f   :  { %v223_v21 = vadd.f32 %v1070_v18, %v222_v20  ;;  %v324_v58 = vmax.f32 %v281_v52, 0.0  ;;  %v1132_v52 = vld [vmem:[%s1237_s5] ss:$0 sm:$0xff] }
  0x91   :  { %v301_v23 = vmax.f32 %v223_v21, 0.0 }
  0x93   :  { %v332_v24 = vpack.c.bf16 %v301_v23, %v300_v22 }
  0x94   :  { %v282_v55 = vpop.f32.mrf.mxu3 }
  0x95   :  { %856 = vmatmul.msk.bf16.vlgmr.msra.gmra.mxu1 %vm162_vm0, %v332_v24  ;;  %v283_v59 = vadd.f32 %v1070_v18, %v282_v55 }
  0x96   :  { %v225_v26 = vpop.f32.mrf.mxu0 }
  0x97   :  { %v226_v27 = vadd.f32 %v1070_v18, %v225_v26  ;;  %v325_v61 = vmax.f32 %v283_v59, 0.0 }
  0x99   :  { %841 = vmatmul.msk.bf16.gmra.mxu0 %vm162_vm0, %v905_v25  ;;  %v302_v30 = vmax.f32 %v226_v27, 0.0  ;;  %v344_v62 = vpack.c.bf16 %v325_v61, %v324_v58 }
  0x9b   :  { %868 = vmatmul.msk.bf16.vlgmr.msrb.gmra.mxu3 %vm162_vm0, %v344_v62 }
  0x9c   :  { %v285_v0 = vpop.f32.mrf.mxu3 }
  0x9d   :  { %v286_v2 = vadd.f32 %v1070_v18, %v285_v0 }
  0x9e   :  { %v227_v28 = vpop.f32.mrf.mxu0 }
  0x9f   :  { %v228_v29 = vadd.f32 %v1070_v18, %v227_v28  ;;  %v326_v8 = vmax.f32 %v286_v2, 0.0 }
  0xa1   :  { %v303_v31 = vmax.f32 %v228_v29, 0.0 }
  0xa3   :  { %v333_v32 = vpack.c.bf16 %v303_v31, %v302_v30  ;;  %v917_v30 = vld [vmem:[%s1238_s6 + $0x8] sm:$0xff]  ;;  %v916_v31 = vld [vmem:[%s1238_s6] sm:$0xff] }
  0xa4   :  { %v287_v5 = vpop.f32.mrf.mxu3  ;;  %627 = vmatpush.bf16.msra.mxu2 %v917_v30  ;;  %922 = vmatpush.bf16.msra.mxu3 %v917_v30 }
  0xa5   :  { %857 = vmatmul.msk.bf16.gmra.mxu1 %vm162_vm0, %v333_v32  ;;  %v288_v9 = vadd.f32 %v1070_v18, %v287_v5 }
  0xa6   :  { %v230_v34 = vpop.f32.mrf.mxu0 }
  0xa7   :  { %v231_v35 = vadd.f32 %v1070_v18, %v230_v34  ;;  %v327_v11 = vmax.f32 %v288_v9, 0.0 }
  0xa8   :  { %628 = vmatpush.bf16.msra.mxu2 %v916_v31  ;;  %923 = vmatpush.bf16.msra.mxu3 %v916_v31 }
  0xa9   :  { %842 = vmatmul.msk.bf16.gmra.mxu0 %vm162_vm0, %v906_v33  ;;  %v304_v38 = vmax.f32 %v231_v35, 0.0  ;;  %v345_v12 = vpack.c.bf16 %v327_v11, %v326_v8 }
  0xab   :  { %869 = vmatmul.msk.bf16.gmra.mxu3 %vm162_vm0, %v345_v12 }
  0xac   :  { %v290_v14 = vpop.f32.mrf.mxu3 }
  0xad   :  { %v291_v16 = vadd.f32 %v1070_v18, %v290_v14 }
  0xae   :  { %v232_v36 = vpop.f32.mrf.mxu0 }
  0xaf   :  { %v233_v37 = vadd.f32 %v1070_v18, %v232_v36  ;;  %v328_v23 = vmax.f32 %v291_v16, 0.0 }
  0xb1   :  { %v305_v39 = vmax.f32 %v233_v37, 0.0 }
  0xb3   :  { %v334_v40 = vpack.c.bf16 %v305_v39, %v304_v38 }
  0xb4   :  { %v292_v20 = vpop.f32.mrf.mxu3 }
  0xb5   :  { %858 = vmatmul.msk.bf16.gmra.mxu1 %vm162_vm0, %v334_v40  ;;  %v293_v24 = vadd.f32 %v1070_v18, %v292_v20 }
  0xb6   :  { %v235_v42 = vpop.f32.mrf.mxu0 }
  0xb7   :  { %v236_v43 = vadd.f32 %v1070_v18, %v235_v42  ;;  %v329_v26 = vmax.f32 %v293_v24, 0.0 }
  0xb9   :  { %843 = vmatmul.msk.bf16.gmra.mxu0 %vm162_vm0, %v907_v41  ;;  %v306_v46 = vmax.f32 %v236_v43, 0.0  ;;  %v346_v27 = vpack.c.bf16 %v329_v26, %v328_v23 }
  0xbb   :  { %870 = vmatmul.msk.bf16.gmra.mxu3 %vm162_vm0, %v346_v27 }
  0xbc   :  { %v295_v29 = vpop.f32.mrf.mxu3 }
  0xbd   :  { %v296_v33 = vadd.f32 %v1070_v18, %v295_v29 }
  0xbe   :  { %v237_v44 = vpop.f32.mrf.mxu0 }
  0xbf   :  { %v238_v45 = vadd.f32 %v1070_v18, %v237_v44  ;;  %v330_v39 = vmax.f32 %v296_v33, 0.0 }
  0xc1   :  { %v307_v47 = vmax.f32 %v238_v45, 0.0 }
  0xc3   :  { %v335_v48 = vpack.c.bf16 %v307_v47, %v306_v46 }
  0xc4   :  { %v297_v36 = vpop.f32.mrf.mxu3 }
  0xc5   :  { %859 = vmatmul.msk.bf16.gmra.mxu1 %vm162_vm0, %v335_v48  ;;  %v298_v40 = vadd.f32 %v1070_v18, %v297_v36 }
  0xc6   :  { %v240_v49 = vpop.f32.mrf.mxu0 }
  0xc7   :  { %v241_v51 = vadd.f32 %v1070_v18, %v240_v49  ;;  %v331_v42 = vmax.f32 %v298_v40, 0.0 }
  0xc9   :  { %v308_v56 = vmax.f32 %v241_v51, 0.0  ;;  %v347_v43 = vpack.c.bf16 %v331_v42, %v330_v39 }
  0xcb   :  { %871 = vmatmul.msk.bf16.gmra.mxu3 %vm162_vm0, %v347_v43 }
  0xce   :  { %v242_v53 = vpop.f32.mrf.mxu0 }
  0xcf   :  { %v243_v54 = vadd.f32 %v1070_v18, %v242_v53 }
  0xd1   :  { %v309_v57 = vmax.f32 %v243_v54, 0.0 }
  0xd3   :  { %v336_v60 = vpack.c.bf16 %v309_v57, %v308_v56 }
  0xd5   :  { %860 = vmatmul.msk.bf16.gmra.mxu1 %vm162_vm0, %v336_v60 }
  0xd6   :  { %v245_v63 = vpop.f32.mrf.mxu0 }
  0xd7   :  { %v246_v1 = vadd.f32 %v1070_v18, %v245_v63 }
  0xd9   :  { %v310_v6 = vmax.f32 %v246_v1, 0.0 }
  0xde   :  { %v247_v3 = vpop.f32.mrf.mxu0 }
  0xdf   :  { %v248_v4 = vadd.f32 %v1070_v18, %v247_v3 }
  0xe1   :  { %v311_v7 = vmax.f32 %v248_v4, 0.0 }
  0xe3   :  { %v337_v10 = vpack.c.bf16 %v311_v7, %v310_v6 }
  0xe5   :  { %861 = vmatmul.msk.bf16.gmra.mxu1 %vm162_vm0, %v337_v10 }
  0xe6   :  { %v250_v13 = vpop.f32.mrf.mxu0 }
  0xe7   :  { %v251_v15 = vadd.f32 %v1070_v18, %v250_v13 }
  0xe9   :  { %v312_v21 = vmax.f32 %v251_v15, 0.0 }
  0xee   :  { %v252_v17 = vpop.f32.mrf.mxu0 }
  0xef   :  { %v253_v19 = vadd.f32 %v1070_v18, %v252_v17 }
  0xf1   :  { %v313_v22 = vmax.f32 %v253_v19, 0.0 }
  0xf3   :  { %v338_v25 = vpack.c.bf16 %v313_v22, %v312_v21 }
  0xf5   :  { %862 = vmatmul.msk.bf16.gmra.mxu1 %vm162_vm0, %v338_v25 }
  0xf6   :  { %v255_v28 = vpop.f32.mrf.mxu0 }
  0xf7   :  { %v256_v32 = vadd.f32 %v1070_v18, %v255_v28 }
  0xf9   :  { %v314_v37 = vmax.f32 %v256_v32, 0.0 }
  0xfe   :  { %v257_v34 = vpop.f32.mrf.mxu0 }
  0xff   :  { %v258_v35 = vadd.f32 %v1070_v18, %v257_v34 }
 0x101   :  { %v315_v38 = vmax.f32 %v258_v35, 0.0 }
 0x103   :  { %v339_v41 = vpack.c.bf16 %v315_v38, %v314_v37 }
 0x105   :  { %863 = vmatmul.msk.bf16.gmra.mxu1 %vm162_vm0, %v339_v41 }
 0x106   :  { %v260_v44 = vpop.f32.mrf.mxu0 }
 0x107   :  { %v261_v45 = vadd.f32 %v1070_v18, %v260_v44 }
 0x109   :  { %v316_v48 = vmax.f32 %v261_v45, 0.0 }
 0x10e   :  { %v262_v46 = vpop.f32.mrf.mxu0 }
 0x10f   :  { %v263_v47 = vadd.f32 %v1070_v18, %v262_v46 }
 0x111   :  { %v317_v49 = vmax.f32 %v263_v47, 0.0 }
 0x112   :  { %v425_v50 = vpop.f32.mrf.mxu1 }
 0x113   :  { %v340_v51 = vpack.c.bf16 %v317_v49, %v316_v48  ;;  %v426_v54 = vadd.f32 %v1132_v52, %v425_v50 }
 0x115   :  { %864 = vmatmul.msk.bf16.gmra.mxu1 %vm162_vm0, %v340_v51  ;;  %v505_v57 = vmax.f32 %v426_v54, 0.0 }
 0x116   :  { %v265_v53 = vpop.f32.mrf.mxu0 }
 0x117   :  { %v266_v58 = vadd.f32 %v1070_v18, %v265_v53 }
 0x119   :  { %v318_v63 = vmax.f32 %v266_v58, 0.0 }
 0x11a   :  { %v427_v55 = vpop.f32.mrf.mxu1 }
 0x11b   :  { %v428_v56 = vadd.f32 %v1132_v52, %v427_v55 }
 0x11d   :  { %v506_v59 = vmax.f32 %v428_v56, 0.0 }
 0x11e   :  { %v267_v60 = vpop.f32.mrf.mxu0  ;;  %v485_v40 = vpop.f32.mrf.mxu3 }
 0x11f   :  { %v537_v61 = vpack.c.bf16 %v506_v59, %v505_v57  ;;  %v268_v62 = vadd.f32 %v1070_v18, %v267_v60  ;;  %v486_v45 = vadd.f32 %v1132_v52, %v485_v40 }
 0x121   :  { %v319_v0 = vmax.f32 %v268_v62, 0.0  ;;  %880 = vmatmul.msk.bf16.vlgmr.msra.gmra.mxu2 %vm162_vm0, %v537_v61  ;;  %v529_v48 = vmax.f32 %v486_v45, 0.0 }
 0x122   :  { %v430_v1 = vpop.f32.mrf.mxu1 }
 0x123   :  { %v341_v2 = vpack.c.bf16 %v319_v0, %v318_v63  ;;  %v431_v4 = vadd.f32 %v1132_v52, %v430_v1 }
 0x125   :  { %865 = vmatmul.msk.bf16.gmra.mxu1 %vm162_vm0, %v341_v2  ;;  %v507_v7 = vmax.f32 %v431_v4, 0.0 }
 0x126   :  { %v270_v3 = vpop.f32.mrf.mxu0  ;;  %v487_v47 = vpop.f32.mrf.mxu3 }
 0x127   :  { %v271_v8 = vadd.f32 %v1070_v18, %v270_v3  ;;  %v488_v49 = vadd.f32 %v1132_v52, %v487_v47 }
 0x129   :  { %v320_v13 = vmax.f32 %v271_v8, 0.0  ;;  %v530_v50 = vmax.f32 %v488_v49, 0.0 }
 0x12a   :  { %v432_v5 = vpop.f32.mrf.mxu1 }
 0x12b   :  { %v433_v6 = vadd.f32 %v1132_v52, %v432_v5  ;;  %v549_v51 = vpack.c.bf16 %v530_v50, %v529_v48 }
 0x12d   :  { %v508_v9 = vmax.f32 %v433_v6, 0.0  ;;  %892 = vmatmul.msk.bf16.vlgmr.msra.gmra.mxu3 %vm162_vm0, %v549_v51 }
 0x12e   :  { %v272_v10 = vpop.f32.mrf.mxu0  ;;  %v490_v55 = vpop.f32.mrf.mxu3 }
 0x12f   :  { %v538_v11 = vpack.c.bf16 %v508_v9, %v507_v7  ;;  %v273_v12 = vadd.f32 %v1070_v18, %v272_v10  ;;  %v491_v60 = vadd.f32 %v1132_v52, %v490_v55 }
 0x131   :  { %v321_v14 = vmax.f32 %v273_v12, 0.0  ;;  %881 = vmatmul.msk.bf16.gmra.mxu2 %vm162_vm0, %v538_v11  ;;  %v531_v63 = vmax.f32 %v491_v60, 0.0 }
 0x132   :  { %v435_v15 = vpop.f32.mrf.mxu1 }
 0x133   :  { %v342_v16 = vpack.c.bf16 %v321_v14, %v320_v13  ;;  %v436_v19 = vadd.f32 %v1132_v52, %v435_v15 }
 0x135   :  { %866 = vmatmul.msk.bf16.gmra.mxu1 %vm162_vm0, %v342_v16  ;;  %v509_v22 = vmax.f32 %v436_v19, 0.0 }
 0x136   :  { %v275_v17 = vpop.f32.mrf.mxu0  ;;  %v492_v62 = vpop.f32.mrf.mxu3 }
 0x137   :  { %v276_v23 = vadd.f32 %v1070_v18, %v275_v17  ;;  %v493_v0 = vadd.f32 %v1132_v52, %v492_v62 }
 0x139   :  { %v322_v28 = vmax.f32 %v276_v23, 0.0  ;;  %v532_v1 = vmax.f32 %v493_v0, 0.0 }
 0x13a   :  { %v437_v20 = vpop.f32.mrf.mxu1 }
 0x13b   :  { %v438_v21 = vadd.f32 %v1132_v52, %v437_v20  ;;  %v550_v2 = vpack.c.bf16 %v532_v1, %v531_v63 }
 0x13d   :  { %v510_v24 = vmax.f32 %v438_v21, 0.0  ;;  %893 = vmatmul.msk.bf16.gmra.mxu3 %vm162_vm0, %v550_v2 }
 0x13e   :  { %v277_v25 = vpop.f32.mrf.mxu0  ;;  %v495_v5 = vpop.f32.mrf.mxu3 }
 0x13f   :  { %v539_v26 = vpack.c.bf16 %v510_v24, %v509_v22  ;;  %v278_v27 = vadd.f32 %v1070_v18, %v277_v25  ;;  %v496_v10 = vadd.f32 %v1132_v52, %v495_v5 }
 0x141   :  { %v323_v29 = vmax.f32 %v278_v27, 0.0  ;;  %882 = vmatmul.msk.bf16.gmra.mxu2 %vm162_vm0, %v539_v26  ;;  %v533_v13 = vmax.f32 %v496_v10, 0.0 }
 0x142   :  { %v440_v30 = vpop.f32.mrf.mxu1 }
 0x143   :  { %v343_v31 = vpack.c.bf16 %v323_v29, %v322_v28  ;;  %v441_v32 = vadd.f32 %v1132_v52, %v440_v30 }
 0x145   :  { %867 = vmatmul.msk.bf16.gmra.mxu1 %vm162_vm0, %v343_v31  ;;  %v511_v35 = vmax.f32 %v441_v32, 0.0 }
 0x146   :  { %v497_v12 = vpop.f32.mrf.mxu3 }
 0x147   :  { %v498_v14 = vadd.f32 %v1132_v52, %v497_v12 }
 0x149   :  { %v534_v15 = vmax.f32 %v498_v14, 0.0 }
 0x14a   :  { %v442_v33 = vpop.f32.mrf.mxu1 }
 0x14b   :  { %v443_v34 = vadd.f32 %v1132_v52, %v442_v33  ;;  %v551_v16 = vpack.c.bf16 %v534_v15, %v533_v13 }
 0x14d   :  { %v512_v36 = vmax.f32 %v443_v34, 0.0  ;;  %894 = vmatmul.msk.bf16.gmra.mxu3 %vm162_vm0, %v551_v16 }
 0x14e   :  { %v500_v20 = vpop.f32.mrf.mxu3 }
 0x14f   :  { %v540_v37 = vpack.c.bf16 %v512_v36, %v511_v35  ;;  %v501_v25 = vadd.f32 %v1132_v52, %v500_v20 }
 0x151   :  { %883 = vmatmul.msk.bf16.gmra.mxu2 %vm162_vm0, %v540_v37  ;;  %v535_v28 = vmax.f32 %v501_v25, 0.0 }
 0x152   :  { %v445_v38 = vpop.f32.mrf.mxu1 }
 0x153   :  { %v446_v18 = vadd.f32 %v1132_v52, %v445_v38  ;;  %v1186_v38 = vld [vmem:[%s1239_s7] ss:$0 sm:$0xff]  ;;  %s956_s7 = smov [#allocation4]  }
 0x154   :  { %s746_s0 = sshll.u32 %s956_s7, 4  ;;  %s747_s0 = int_to_ptr.vmem [resolvable:$true] %s746_s0 }
 0x155   :  { %v513_v42 = vmax.f32 %v446_v18, 0.0 }
 0x156   :  { %v502_v27 = vpop.f32.mrf.mxu3 }
 0x157   :  { %v503_v29 = vadd.f32 %v1132_v52, %v502_v27 }
 0x159   :  { %v536_v30 = vmax.f32 %v503_v29, 0.0 }
 0x15a   :  { %v447_v39 = vpop.f32.mrf.mxu1 }
 0x15b   :  { %v448_v41 = vadd.f32 %v1132_v52, %v447_v39  ;;  %v552_v31 = vpack.c.bf16 %v536_v30, %v535_v28 }
 0x15d   :  { %v514_v43 = vmax.f32 %v448_v41, 0.0  ;;  %895 = vmatmul.msk.bf16.gmra.mxu3 %vm162_vm0, %v552_v31 }
 0x15f   :  { %v541_v44 = vpack.c.bf16 %v514_v43, %v513_v42 }
 0x161   :  { %884 = vmatmul.msk.bf16.gmra.mxu2 %vm162_vm0, %v541_v44 }
 0x162   :  { %v450_v46 = vpop.f32.mrf.mxu1 }
 0x163   :  { %v451_v53 = vadd.f32 %v1132_v52, %v450_v46 }
 0x165   :  { %v515_v57 = vmax.f32 %v451_v53, 0.0 }
 0x16a   :  { %v452_v54 = vpop.f32.mrf.mxu1 }
 0x16b   :  { %v453_v56 = vadd.f32 %v1132_v52, %v452_v54 }
 0x16d   :  { %v516_v58 = vmax.f32 %v453_v56, 0.0 }
 0x16f   :  { %v542_v59 = vpack.c.bf16 %v516_v58, %v515_v57 }
 0x171   :  { %885 = vmatmul.msk.bf16.gmra.mxu2 %vm162_vm0, %v542_v59 }
 0x172   :  { %v455_v61 = vpop.f32.mrf.mxu1 }
 0x173   :  { %v456_v3 = vadd.f32 %v1132_v52, %v455_v61 }
 0x175   :  { %v517_v7 = vmax.f32 %v456_v3, 0.0 }
 0x17a   :  { %v457_v4 = vpop.f32.mrf.mxu1 }
 0x17b   :  { %v458_v6 = vadd.f32 %v1132_v52, %v457_v4 }
 0x17d   :  { %v518_v8 = vmax.f32 %v458_v6, 0.0 }
 0x17f   :  { %v543_v9 = vpack.c.bf16 %v518_v8, %v517_v7 }
 0x181   :  { %886 = vmatmul.msk.bf16.gmra.mxu2 %vm162_vm0, %v543_v9 }
 0x182   :  { %v460_v11 = vpop.f32.mrf.mxu1 }
 0x183   :  { %v461_v17 = vadd.f32 %v1132_v52, %v460_v11 }
 0x185   :  { %v519_v22 = vmax.f32 %v461_v17, 0.0 }
 0x18a   :  { %v462_v19 = vpop.f32.mrf.mxu1 }
 0x18b   :  { %v463_v21 = vadd.f32 %v1132_v52, %v462_v19 }
 0x18d   :  { %v520_v23 = vmax.f32 %v463_v21, 0.0 }
 0x18f   :  { %v544_v24 = vpack.c.bf16 %v520_v23, %v519_v22 }
 0x191   :  { %887 = vmatmul.msk.bf16.gmra.mxu2 %vm162_vm0, %v544_v24 }
 0x192   :  { %v465_v26 = vpop.f32.mrf.mxu1 }
 0x193   :  { %v466_v32 = vadd.f32 %v1132_v52, %v465_v26 }
 0x195   :  { %v521_v35 = vmax.f32 %v466_v32, 0.0 }
 0x19a   :  { %v467_v33 = vpop.f32.mrf.mxu1 }
 0x19b   :  { %v468_v34 = vadd.f32 %v1132_v52, %v467_v33 }
 0x19d   :  { %v522_v36 = vmax.f32 %v468_v34, 0.0 }
 0x19f   :  { %v545_v37 = vpack.c.bf16 %v522_v36, %v521_v35 }
 0x1a1   :  { %888 = vmatmul.msk.bf16.gmra.mxu2 %vm162_vm0, %v545_v37 }
 0x1a2   :  { %v470_v18 = vpop.f32.mrf.mxu1 }
 0x1a3   :  { %v471_v41 = vadd.f32 %v1132_v52, %v470_v18 }
 0x1a4   :  { %v630_v39 = vpop.f32.mrf.mxu2 }
 0x1a5   :  { %v631_v40 = vadd.f32 %v1186_v38, %v630_v39  ;;  %v523_v45 = vmax.f32 %v471_v41, 0.0 }
 0x1a7   :  { %710 = vst [vmem:[#allocation4] sm:$0xff] %v631_v40 }
 0x1aa   :  { %v472_v42 = vpop.f32.mrf.mxu1 }
 0x1ab   :  { %v473_v43 = vadd.f32 %v1132_v52, %v472_v42 }
 0x1ac   :  { %v632_v44 = vpop.f32.mrf.mxu2 }
 0x1ad   :  { %v524_v46 = vmax.f32 %v473_v43, 0.0  ;;  %v633_v47 = vadd.f32 %v1186_v38, %v632_v44 }
 0x1af   :  { %v546_v48 = vpack.c.bf16 %v524_v46, %v523_v45  ;;  %711 = vst [vmem:[#allocation4 + $0x8] sm:$0xff] %v633_v47 }
 0x1b0   :  { %v690_v14 = vpop.f32.mrf.mxu3 }
 0x1b1   :  { %889 = vmatmul.msk.bf16.gmra.mxu2 %vm162_vm0, %v546_v48  ;;  %v691_v16 = vadd.f32 %v1186_v38, %v690_v14 }
 0x1b2   :  { %v475_v49 = vpop.f32.mrf.mxu1 }
 0x1b3   :  { %v476_v53 = vadd.f32 %v1132_v52, %v475_v49  ;;  %734 = vst [vmem:[#allocation4 + $0xc0] sm:$0xff] %v691_v16 }
 0x1b4   :  { %v635_v50 = vpop.f32.mrf.mxu2 }
 0x1b5   :  { %v636_v51 = vadd.f32 %v1186_v38, %v635_v50  ;;  %v525_v57 = vmax.f32 %v476_v53, 0.0 }
 0x1b7   :  { %712 = vst [vmem:[#allocation4 + $0x10] sm:$0xff] %v636_v51 }
 0x1b8   :  { %v692_v19 = vpop.f32.mrf.mxu3 }
 0x1b9   :  { %v693_v21 = vadd.f32 %v1186_v38, %v692_v19 }
 0x1ba   :  { %v477_v54 = vpop.f32.mrf.mxu1 }
 0x1bb   :  { %v478_v55 = vadd.f32 %v1132_v52, %v477_v54  ;;  %735 = vst [vmem:[#allocation4 + $0xc8] sm:$0xff] %v693_v21 }
 0x1bc   :  { %v637_v56 = vpop.f32.mrf.mxu2 }
 0x1bd   :  { %v526_v58 = vmax.f32 %v478_v55, 0.0  ;;  %v638_v59 = vadd.f32 %v1186_v38, %v637_v56 }
 0x1bf   :  { %v547_v60 = vpack.c.bf16 %v526_v58, %v525_v57  ;;  %713 = vst [vmem:[#allocation4 + $0x18] sm:$0xff] %v638_v59 }
 0x1c0   :  { %v695_v23 = vpop.f32.mrf.mxu3 }
 0x1c1   :  { %890 = vmatmul.msk.bf16.gmra.mxu2 %vm162_vm0, %v547_v60  ;;  %v696_v25 = vadd.f32 %v1186_v38, %v695_v23 }
 0x1c2   :  { %v480_v61 = vpop.f32.mrf.mxu1 }
 0x1c3   :  { %v481_v0 = vadd.f32 %v1132_v52, %v480_v61  ;;  %736 = vst [vmem:[#allocation4 + $0xd0] sm:$0xff] %v696_v25 }
 0x1c4   :  { %v640_v62 = vpop.f32.mrf.mxu2 }
 0x1c5   :  { %v641_v63 = vadd.f32 %v1186_v38, %v640_v62  ;;  %v527_v4 = vmax.f32 %v481_v0, 0.0 }
 0x1c7   :  { %714 = vst [vmem:[#allocation4 + $0x20] sm:$0xff] %v641_v63 }
 0x1c8   :  { %v697_v27 = vpop.f32.mrf.mxu3 }
 0x1c9   :  { %v698_v29 = vadd.f32 %v1186_v38, %v697_v27 }
 0x1ca   :  { %v482_v1 = vpop.f32.mrf.mxu1 }
 0x1cb   :  { %v483_v2 = vadd.f32 %v1132_v52, %v482_v1  ;;  %737 = vst [vmem:[#allocation4 + $0xd8] sm:$0xff] %v698_v29 }
 0x1cc   :  { %v642_v3 = vpop.f32.mrf.mxu2 }
 0x1cd   :  { %v528_v5 = vmax.f32 %v483_v2, 0.0  ;;  %v643_v6 = vadd.f32 %v1186_v38, %v642_v3 }
 0x1cf   :  { %v548_v7 = vpack.c.bf16 %v528_v5, %v527_v4  ;;  %715 = vst [vmem:[#allocation4 + $0x28] sm:$0xff] %v643_v6 }
 0x1d0   :  { %v700_v31 = vpop.f32.mrf.mxu3 }
 0x1d1   :  { %891 = vmatmul.msk.bf16.gmra.mxu2 %vm162_vm0, %v548_v7  ;;  %v701_v33 = vadd.f32 %v1186_v38, %v700_v31 }
 0x1d3   :  { %738 = vst [vmem:[#allocation4 + $0xe0] sm:$0xff] %v701_v33 }
 0x1d4   :  { %v645_v8 = vpop.f32.mrf.mxu2 }
 0x1d5   :  { %v646_v9 = vadd.f32 %v1186_v38, %v645_v8 }
 0x1d7   :  { %716 = vst [vmem:[#allocation4 + $0x30] sm:$0xff] %v646_v9 }
 0x1d8   :  { %v702_v35 = vpop.f32.mrf.mxu3 }
 0x1d9   :  { %v703_v37 = vadd.f32 %v1186_v38, %v702_v35 }
 0x1db   :  { %739 = vst [vmem:[#allocation4 + $0xe8] sm:$0xff] %v703_v37 }
 0x1dc   :  { %v647_v10 = vpop.f32.mrf.mxu2 }
 0x1dd   :  { %v648_v11 = vadd.f32 %v1186_v38, %v647_v10 }
 0x1df   :  { %717 = vst [vmem:[#allocation4 + $0x38] sm:$0xff] %v648_v11 }
 0x1e0   :  { %v705_v39 = vpop.f32.mrf.mxu3 }
 0x1e1   :  { %v706_v41 = vadd.f32 %v1186_v38, %v705_v39 }
 0x1e3   :  { %740 = vst [vmem:[#allocation4 + $0xf0] sm:$0xff] %v706_v41 }
 0x1e4   :  { %v650_v12 = vpop.f32.mrf.mxu2 }
 0x1e5   :  { %v651_v52 = vadd.f32 %v1186_v38, %v650_v12 }
 0x1e7   :  { %718 = vst [vmem:[#allocation4 + $0x40] sm:$0xff] %v651_v52 }
 0x1e8   :  { %v707_v43 = vpop.f32.mrf.mxu3 }
 0x1e9   :  { %v708_v45 = vadd.f32 %v1186_v38, %v707_v43 }
 0x1eb   :  { %741 = vst [vmem:[#allocation4 + $0xf8] sm:$0xff] %v708_v45 }
 0x1ec   :  { %v652_v13 = vpop.f32.mrf.mxu2 }
 0x1ed   :  { %v653_v15 = vadd.f32 %v1186_v38, %v652_v13 }
 0x1ef   :  { %719 = vst [vmem:[#allocation4 + $0x48] sm:$0xff] %v653_v15 }
 0x1f4   :  { %v655_v17 = vpop.f32.mrf.mxu2 }
 0x1f5   :  { %v656_v20 = vadd.f32 %v1186_v38, %v655_v17 }
 0x1f7   :  { %720 = vst [vmem:[#allocation4 + $0x50] sm:$0xff] %v656_v20 }
 0x1fc   :  { %v657_v22 = vpop.f32.mrf.mxu2 }
 0x1fd   :  { %v658_v24 = vadd.f32 %v1186_v38, %v657_v22 }
 0x1ff   :  { %721 = vst [vmem:[#allocation4 + $0x58] sm:$0xff] %v658_v24 }
 0x204   :  { %v660_v26 = vpop.f32.mrf.mxu2 }
 0x205   :  { %v661_v28 = vadd.f32 %v1186_v38, %v660_v26 }
 0x207   :  { %722 = vst [vmem:[#allocation4 + $0x60] sm:$0xff] %v661_v28 }
 0x20c   :  { %v662_v30 = vpop.f32.mrf.mxu2 }
 0x20d   :  { %v663_v32 = vadd.f32 %v1186_v38, %v662_v30 }
 0x20f   :  { %723 = vst [vmem:[#allocation4 + $0x68] sm:$0xff] %v663_v32 }
 0x214   :  { %v665_v34 = vpop.f32.mrf.mxu2 }
 0x215   :  { %v666_v36 = vadd.f32 %v1186_v38, %v665_v34 }
 0x217   :  { %724 = vst [vmem:[#allocation4 + $0x70] sm:$0xff] %v666_v36 }
 0x21c   :  { %v667_v18 = vpop.f32.mrf.mxu2 }
 0x21d   :  { %v668_v40 = vadd.f32 %v1186_v38, %v667_v18 }
 0x21f   :  { %725 = vst [vmem:[#allocation4 + $0x78] sm:$0xff] %v668_v40 }
 0x224   :  { %v670_v42 = vpop.f32.mrf.mxu2 }
 0x225   :  { %v671_v44 = vadd.f32 %v1186_v38, %v670_v42 }
 0x227   :  { %726 = vst [vmem:[#allocation4 + $0x80] sm:$0xff] %v671_v44 }
 0x22c   :  { %v672_v46 = vpop.f32.mrf.mxu2 }
 0x22d   :  { %v673_v47 = vadd.f32 %v1186_v38, %v672_v46 }
 0x22f   :  { %727 = vst [vmem:[#allocation4 + $0x88] sm:$0xff] %v673_v47 }
 0x234   :  { %v675_v48 = vpop.f32.mrf.mxu2 }
 0x235   :  { %v676_v49 = vadd.f32 %v1186_v38, %v675_v48 }
 0x237   :  { %728 = vst [vmem:[#allocation4 + $0x90] sm:$0xff] %v676_v49 }
 0x23c   :  { %v677_v50 = vpop.f32.mrf.mxu2 }
 0x23d   :  { %v678_v51 = vadd.f32 %v1186_v38, %v677_v50 }
 0x23f   :  { %729 = vst [vmem:[#allocation4 + $0x98] sm:$0xff] %v678_v51 }
 0x244   :  { %v680_v53 = vpop.f32.mrf.mxu2 }
 0x245   :  { %v681_v54 = vadd.f32 %v1186_v38, %v680_v53 }
 0x247   :  { %730 = vst [vmem:[#allocation4 + $0xa0] sm:$0xff] %v681_v54 }
 0x24c   :  { %v682_v55 = vpop.f32.mrf.mxu2 }
 0x24d   :  { %v683_v56 = vadd.f32 %v1186_v38, %v682_v55 }
 0x24f   :  { %731 = vst [vmem:[#allocation4 + $0xa8] sm:$0xff] %v683_v56 }
 0x254   :  { %v685_v57 = vpop.f32.mrf.mxu2 }
 0x255   :  { %v686_v58 = vadd.f32 %v1186_v38, %v685_v57 }
 0x257   :  { %732 = vst [vmem:[#allocation4 + $0xb0] sm:$0xff] %v686_v58 }
 0x25c   :  { %v687_v59 = vpop.f32.mrf.mxu2 }
 0x25d   :  { %v688_v60 = vadd.f32 %v1186_v38, %v687_v59 }
 0x25f   :  { %733 = vst [vmem:[#allocation4 + $0xb8] sm:$0xff] %v688_v60 }
 0x260   :  { %754 = dma.vmem_to_hbm [thread:$0]  %s747_s0, 4096, %s749_s26, [#allocation5], %s957_s27, %s957_s27, %s958_s28  }
 0x261   :  { %954 = dma.done.wait [#allocation5], 4096  }
 0x262   :  { %955 = vsyncadd [#allocation5], 4294963200 }
 0x263   :  { %759 = vsyncpa [#allocation5], 1 }

// kernel: tpu_custom_call.1
= control target key start
LH: loop header
LB: loop body
LE: loop exit
PB: predicated region body
PF: predicated region fallthrough
CT: control target
= control target key end

     0   :  { %s1232_s0 = inlined_call_operand.<no memory space> [shape: s32[1], index: 0, kind: input, shape index: {}]   ;;  %s1233_s1 = inlined_call_operand.vmem [shape: bf16[256,32], index: 1, kind: input, shape index: {}]   ;;  %s1234_s2 = inlined_call_operand.vmem [shape: bf16[32,32], index: 2, kind: input, shape index: {}]   ;;  %s1235_s3 = inlined_call_operand.vmem [shape: f32[1,32], index: 3, kind: input, shape index: {}]   ;;  %s1236_s4 = inlined_call_operand.vmem [shape: bf16[32,32], index: 4, kind: input, shape index: {}]   ;;  %s1237_s5 = inlined_call_operand.vmem [shape: f32[1,32], index: 5, kind: input, shape index: {}]   ;;  %s1238_s6 = inlined_call_operand.vmem [shape: bf16[32,128], index: 6, kind: input, shape index: {}]   ;;  %s1239_s7 = inlined_call_operand.vmem [shape: f32[1,128], index: 7, kind: input, shape index: {}]   ;;  %s1240_s8 = inlined_call_operand.hbm [shape: f32[256,128], index: 8, kind: output, shape index: {}]  }
   0x1   :  { %v913_v0 = vld [vmem:[%s1234_s2 + $0x8] sm:$0xff]  ;;  %v912_v1 = vld [vmem:[%s1234_s2] sm:$0xff] }
   0x2   :  { %217 = vmatpush.bf16.msra.mxu0 %v913_v0  ;;  %918 = vmatpush.bf16.msra.mxu3 %v913_v0 }
   0x3   :  { %14 = vsyncpa [#allocation5], 0  ;;  %v896_v2 = vld [vmem:[%s1233_s1] sm:$0xff]  ;;  %vm162_vm0 = vcmask 261120   ;;  %v897_v3 = vld [vmem:[%s1233_s1 + $0x8] sm:$0xff]  ;;  %s748_s26 = sshll.u32 %s1240_s8, 4  ;;  %s749_s26 = int_to_ptr.hbm [resolvable:$true] %s748_s26 }
   0x4   :  { %v898_v4 = vld [vmem:[%s1233_s1 + $0x10] sm:$0xff]  ;;  %v899_v5 = vld [vmem:[%s1233_s1 + $0x18] sm:$0xff]  ;;  %v908_v6 = vld [vmem:[%s1233_s1 + $0x60] sm:$0xff]  ;;  %s957_s27 = smov 128   ;;  %s958_s28 = smov 8  }
   0x5   :  { %v900_v7 = vld [vmem:[%s1233_s1 + $0x20] sm:$0xff]  ;;  %v909_v8 = vld [vmem:[%s1233_s1 + $0x68] sm:$0xff]  ;;  %v910_v10 = vld [vmem:[%s1233_s1 + $0x70] sm:$0xff] }
   0x6   :  { %218 = vmatpush.bf16.msra.mxu0 %v912_v1  ;;  %919 = vmatpush.bf16.msra.mxu3 %v912_v1  ;;  %v901_v9 = vld [vmem:[%s1233_s1 + $0x28] sm:$0xff]  ;;  %v902_v11 = vld [vmem:[%s1233_s1 + $0x30] sm:$0xff]  ;;  %v914_v13 = vld [vmem:[%s1236_s4] sm:$0xff] }
   0x7   :  { %v915_v12 = vld [vmem:[%s1236_s4 + $0x8] sm:$0xff]  ;;  %v911_v14 = vld [vmem:[%s1233_s1 + $0x78] sm:$0xff]  ;;  %v904_v16 = vld [vmem:[%s1233_s1 + $0x40] sm:$0xff] }
   0x8   :  { %422 = vmatpush.bf16.msra.mxu1 %v915_v12  ;;  %v903_v15 = vld [vmem:[%s1233_s1 + $0x38] sm:$0xff]  ;;  %v1070_v18 = vld [vmem:[%s1235_s3] ss:$0 sm:$0xff]  ;;  %v905_v25 = vld [vmem:[%s1233_s1 + $0x48] sm:$0xff] }
   0x9   :  { %832 = vmatmul.msk.bf16.vlgmr.msra.gmra.mxu0 %vm162_vm0, %v896_v2  ;;  %844 = vmatmul.msk.bf16.vlgmr.msra.gmra.mxu3 %vm162_vm0, %v908_v6  ;;  %v906_v33 = vld [vmem:[%s1233_s1 + $0x50] sm:$0xff]  ;;  %v907_v41 = vld [vmem:[%s1233_s1 + $0x58] sm:$0xff] }
   0xa   :  { %920 = vmatpush.bf16.msrb.mxu3 %v915_v12 }
   0xc   :  { %423 = vmatpush.bf16.msra.mxu1 %v914_v13 }
   0xe   :  { %921 = vmatpush.bf16.msrb.mxu3 %v914_v13 }
  0x19   :  { %833 = vmatmul.msk.bf16.gmra.mxu0 %vm162_vm0, %v897_v3  ;;  %845 = vmatmul.msk.bf16.gmra.mxu3 %vm162_vm0, %v909_v8 }
  0x29   :  { %834 = vmatmul.msk.bf16.gmra.mxu0 %vm162_vm0, %v898_v4  ;;  %846 = vmatmul.msk.bf16.gmra.mxu3 %vm162_vm0, %v910_v10 }
  0x39   :  { %835 = vmatmul.msk.bf16.gmra.mxu0 %vm162_vm0, %v899_v5  ;;  %847 = vmatmul.msk.bf16.gmra.mxu3 %vm162_vm0, %v911_v14 }
  0x49   :  { %836 = vmatmul.msk.bf16.gmra.mxu0 %vm162_vm0, %v900_v7 }
  0x59   :  { %837 = vmatmul.msk.bf16.gmra.mxu0 %vm162_vm0, %v901_v9 }
  0x69   :  { %838 = vmatmul.msk.bf16.gmra.mxu0 %vm162_vm0, %v902_v11 }
  0x79   :  { %839 = vmatmul.msk.bf16.gmra.mxu0 %vm162_vm0, %v903_v15 }
  0x86   :  { %v220_v17 = vpop.f32.mrf.mxu0 }
  0x87   :  { %v221_v19 = vadd.f32 %v1070_v18, %v220_v17 }
  0x89   :  { %840 = vmatmul.msk.bf16.gmra.mxu0 %vm162_vm0, %v904_v16  ;;  %v300_v22 = vmax.f32 %v221_v19, 0.0 }
  0x8c   :  { %v280_v50 = vpop.f32.mrf.mxu3 }
  0x8d   :  { %v281_v52 = vadd.f32 %v1070_v18, %v280_v50 }
  0x8e   :  { %v222_v20 = vpop.f32.mrf.mxu0 }
  0x8f   :  { %v223_v21 = vadd.f32 %v1070_v18, %v222_v20  ;;  %v324_v58 = vmax.f32 %v281_v52, 0.0  ;;  %v1132_v52 = vld [vmem:[%s1237_s5] ss:$0 sm:$0xff] }
  0x91   :  { %v301_v23 = vmax.f32 %v223_v21, 0.0 }
  0x93   :  { %v332_v24 = vpack.c.bf16 %v301_v23, %v300_v22 }
  0x94   :  { %v282_v55 = vpop.f32.mrf.mxu3 }
  0x95   :  { %856 = vmatmul.msk.bf16.vlgmr.msra.gmra.mxu1 %vm162_vm0, %v332_v24  ;;  %v283_v59 = vadd.f32 %v1070_v18, %v282_v55 }
  0x96   :  { %v225_v26 = vpop.f32.mrf.mxu0 }
  0x97   :  { %v226_v27 = vadd.f32 %v1070_v18, %v225_v26  ;;  %v325_v61 = vmax.f32 %v283_v59, 0.0 }
  0x99   :  { %841 = vmatmul.msk.bf16.gmra.mxu0 %vm162_vm0, %v905_v25  ;;  %v302_v30 = vmax.f32 %v226_v27, 0.0  ;;  %v344_v62 = vpack.c.bf16 %v325_v61, %v324_v58 }
  0x9b   :  { %868 = vmatmul.msk.bf16.vlgmr.msrb.gmra.mxu3 %vm162_vm0, %v344_v62 }
  0x9c   :  { %v285_v0 = vpop.f32.mrf.mxu3 }
  0x9d   :  { %v286_v2 = vadd.f32 %v1070_v18, %v285_v0 }
  0x9e   :  { %v227_v28 = vpop.f32.mrf.mxu0 }
  0x9f   :  { %v228_v29 = vadd.f32 %v1070_v18, %v227_v28  ;;  %v326_v8 = vmax.f32 %v286_v2, 0.0 }
  0xa1   :  { %v303_v31 = vmax.f32 %v228_v29, 0.0 }
  0xa3   :  { %v333_v32 = vpack.c.bf16 %v303_v31, %v302_v30  ;;  %v917_v30 = vld [vmem:[%s1238_s6 + $0x8] sm:$0xff]  ;;  %v916_v31 = vld [vmem:[%s1238_s6] sm:$0xff] }
  0xa4   :  { %v287_v5 = vpop.f32.mrf.mxu3  ;;  %627 = vmatpush.bf16.msra.mxu2 %v917_v30  ;;  %922 = vmatpush.bf16.msra.mxu3 %v917_v30 }
  0xa5   :  { %857 = vmatmul.msk.bf16.gmra.mxu1 %vm162_vm0, %v333_v32  ;;  %v288_v9 = vadd.f32 %v1070_v18, %v287_v5 }
  0xa6   :  { %v230_v34 = vpop.f32.mrf.mxu0 }
  0xa7   :  { %v231_v35 = vadd.f32 %v1070_v18, %v230_v34  ;;  %v327_v11 = vmax.f32 %v288_v9, 0.0 }
  0xa8   :  { %628 = vmatpush.bf16.msra.mxu2 %v916_v31  ;;  %923 = vmatpush.bf16.msra.mxu3 %v916_v31 }
  0xa9   :  { %842 = vmatmul.msk.bf16.gmra.mxu0 %vm162_vm0, %v906_v33  ;;  %v304_v38 = vmax.f32 %v231_v35, 0.0  ;;  %v345_v12 = vpack.c.bf16 %v327_v11, %v326_v8 }
  0xab   :  { %869 = vmatmul.msk.bf16.gmra.mxu3 %vm162_vm0, %v345_v12 }
  0xac   :  { %v290_v14 = vpop.f32.mrf.mxu3 }
  0xad   :  { %v291_v16 = vadd.f32 %v1070_v18, %v290_v14 }
  0xae   :  { %v232_v36 = vpop.f32.mrf.mxu0 }
  0xaf   :  { %v233_v37 = vadd.f32 %v1070_v18, %v232_v36  ;;  %v328_v23 = vmax.f32 %v291_v16, 0.0 }
  0xb1   :  { %v305_v39 = vmax.f32 %v233_v37, 0.0 }
  0xb3   :  { %v334_v40 = vpack.c.bf16 %v305_v39, %v304_v38 }
  0xb4   :  { %v292_v20 = vpop.f32.mrf.mxu3 }
  0xb5   :  { %858 = vmatmul.msk.bf16.gmra.mxu1 %vm162_vm0, %v334_v40  ;;  %v293_v24 = vadd.f32 %v1070_v18, %v292_v20 }
  0xb6   :  { %v235_v42 = vpop.f32.mrf.mxu0 }
  0xb7   :  { %v236_v43 = vadd.f32 %v1070_v18, %v235_v42  ;;  %v329_v26 = vmax.f32 %v293_v24, 0.0 }
  0xb9   :  { %843 = vmatmul.msk.bf16.gmra.mxu0 %vm162_vm0, %v907_v41  ;;  %v306_v46 = vmax.f32 %v236_v43, 0.0  ;;  %v346_v27 = vpack.c.bf16 %v329_v26, %v328_v23 }
  0xbb   :  { %870 = vmatmul.msk.bf16.gmra.mxu3 %vm162_vm0, %v346_v27 }
  0xbc   :  { %v295_v29 = vpop.f32.mrf.mxu3 }
  0xbd   :  { %v296_v33 = vadd.f32 %v1070_v18, %v295_v29 }
  0xbe   :  { %v237_v44 = vpop.f32.mrf.mxu0 }
  0xbf   :  { %v238_v45 = vadd.f32 %v1070_v18, %v237_v44  ;;  %v330_v39 = vmax.f32 %v296_v33, 0.0 }
  0xc1   :  { %v307_v47 = vmax.f32 %v238_v45, 0.0 }
  0xc3   :  { %v335_v48 = vpack.c.bf16 %v307_v47, %v306_v46 }
  0xc4   :  { %v297_v36 = vpop.f32.mrf.mxu3 }
  0xc5   :  { %859 = vmatmul.msk.bf16.gmra.mxu1 %vm162_vm0, %v335_v48  ;;  %v298_v40 = vadd.f32 %v1070_v18, %v297_v36 }
  0xc6   :  { %v240_v49 = vpop.f32.mrf.mxu0 }
  0xc7   :  { %v241_v51 = vadd.f32 %v1070_v18, %v240_v49  ;;  %v331_v42 = vmax.f32 %v298_v40, 0.0 }
  0xc9   :  { %v308_v56 = vmax.f32 %v241_v51, 0.0  ;;  %v347_v43 = vpack.c.bf16 %v331_v42, %v330_v39 }
  0xcb   :  { %871 = vmatmul.msk.bf16.gmra.mxu3 %vm162_vm0, %v347_v43 }
  0xce   :  { %v242_v53 = vpop.f32.mrf.mxu0 }
  0xcf   :  { %v243_v54 = vadd.f32 %v1070_v18, %v242_v53 }
  0xd1   :  { %v309_v57 = vmax.f32 %v243_v54, 0.0 }
  0xd3   :  { %v336_v60 = vpack.c.bf16 %v309_v57, %v308_v56 }
  0xd5   :  { %860 = vmatmul.msk.bf16.gmra.mxu1 %vm162_vm0, %v336_v60 }
  0xd6   :  { %v245_v63 = vpop.f32.mrf.mxu0 }
  0xd7   :  { %v246_v1 = vadd.f32 %v1070_v18, %v245_v63 }
  0xd9   :  { %v310_v6 = vmax.f32 %v246_v1, 0.0 }
  0xde   :  { %v247_v3 = vpop.f32.mrf.mxu0 }
  0xdf   :  { %v248_v4 = vadd.f32 %v1070_v18, %v247_v3 }
  0xe1   :  { %v311_v7 = vmax.f32 %v248_v4, 0.0 }
  0xe3   :  { %v337_v10 = vpack.c.bf16 %v311_v7, %v310_v6 }
  0xe5   :  { %861 = vmatmul.msk.bf16.gmra.mxu1 %vm162_vm0, %v337_v10 }
  0xe6   :  { %v250_v13 = vpop.f32.mrf.mxu0 }
  0xe7   :  { %v251_v15 = vadd.f32 %v1070_v18, %v250_v13 }
  0xe9   :  { %v312_v21 = vmax.f32 %v251_v15, 0.0 }
  0xee   :  { %v252_v17 = vpop.f32.mrf.mxu0 }
  0xef   :  { %v253_v19 = vadd.f32 %v1070_v18, %v252_v17 }
  0xf1   :  { %v313_v22 = vmax.f32 %v253_v19, 0.0 }
  0xf3   :  { %v338_v25 = vpack.c.bf16 %v313_v22, %v312_v21 }
  0xf5   :  { %862 = vmatmul.msk.bf16.gmra.mxu1 %vm162_vm0, %v338_v25 }
  0xf6   :  { %v255_v28 = vpop.f32.mrf.mxu0 }
  0xf7   :  { %v256_v32 = vadd.f32 %v1070_v18, %v255_v28 }
  0xf9   :  { %v314_v37 = vmax.f32 %v256_v32, 0.0 }
  0xfe   :  { %v257_v34 = vpop.f32.mrf.mxu0 }
  0xff   :  { %v258_v35 = vadd.f32 %v1070_v18, %v257_v34 }
 0x101   :  { %v315_v38 = vmax.f32 %v258_v35, 0.0 }
 0x103   :  { %v339_v41 = vpack.c.bf16 %v315_v38, %v314_v37 }
 0x105   :  { %863 = vmatmul.msk.bf16.gmra.mxu1 %vm162_vm0, %v339_v41 }
 0x106   :  { %v260_v44 = vpop.f32.mrf.mxu0 }
 0x107   :  { %v261_v45 = vadd.f32 %v1070_v18, %v260_v44 }
 0x109   :  { %v316_v48 = vmax.f32 %v261_v45, 0.0 }
 0x10e   :  { %v262_v46 = vpop.f32.mrf.mxu0 }
 0x10f   :  { %v263_v47 = vadd.f32 %v1070_v18, %v262_v46 }
 0x111   :  { %v317_v49 = vmax.f32 %v263_v47, 0.0 }
 0x112   :  { %v425_v50 = vpop.f32.mrf.mxu1 }
 0x113   :  { %v340_v51 = vpack.c.bf16 %v317_v49, %v316_v48  ;;  %v426_v54 = vadd.f32 %v1132_v52, %v425_v50 }
 0x115   :  { %864 = vmatmul.msk.bf16.gmra.mxu1 %vm162_vm0, %v340_v51  ;;  %v505_v57 = vmax.f32 %v426_v54, 0.0 }
 0x116   :  { %v265_v53 = vpop.f32.mrf.mxu0 }
 0x117   :  { %v266_v58 = vadd.f32 %v1070_v18, %v265_v53 }
 0x119   :  { %v318_v63 = vmax.f32 %v266_v58, 0.0 }
 0x11a   :  { %v427_v55 = vpop.f32.mrf.mxu1 }
 0x11b   :  { %v428_v56 = vadd.f32 %v1132_v52, %v427_v55 }
 0x11d   :  { %v506_v59 = vmax.f32 %v428_v56, 0.0 }
 0x11e   :  { %v267_v60 = vpop.f32.mrf.mxu0  ;;  %v485_v40 = vpop.f32.mrf.mxu3 }
 0x11f   :  { %v537_v61 = vpack.c.bf16 %v506_v59, %v505_v57  ;;  %v268_v62 = vadd.f32 %v1070_v18, %v267_v60  ;;  %v486_v45 = vadd.f32 %v1132_v52, %v485_v40 }
 0x121   :  { %v319_v0 = vmax.f32 %v268_v62, 0.0  ;;  %880 = vmatmul.msk.bf16.vlgmr.msra.gmra.mxu2 %vm162_vm0, %v537_v61  ;;  %v529_v48 = vmax.f32 %v486_v45, 0.0 }
 0x122   :  { %v430_v1 = vpop.f32.mrf.mxu1 }
 0x123   :  { %v341_v2 = vpack.c.bf16 %v319_v0, %v318_v63  ;;  %v431_v4 = vadd.f32 %v1132_v52, %v430_v1 }
 0x125   :  { %865 = vmatmul.msk.bf16.gmra.mxu1 %vm162_vm0, %v341_v2  ;;  %v507_v7 = vmax.f32 %v431_v4, 0.0 }
 0x126   :  { %v270_v3 = vpop.f32.mrf.mxu0  ;;  %v487_v47 = vpop.f32.mrf.mxu3 }
 0x127   :  { %v271_v8 = vadd.f32 %v1070_v18, %v270_v3  ;;  %v488_v49 = vadd.f32 %v1132_v52, %v487_v47 }
 0x129   :  { %v320_v13 = vmax.f32 %v271_v8, 0.0  ;;  %v530_v50 = vmax.f32 %v488_v49, 0.0 }
 0x12a   :  { %v432_v5 = vpop.f32.mrf.mxu1 }
 0x12b   :  { %v433_v6 = vadd.f32 %v1132_v52, %v432_v5  ;;  %v549_v51 = vpack.c.bf16 %v530_v50, %v529_v48 }
 0x12d   :  { %v508_v9 = vmax.f32 %v433_v6, 0.0  ;;  %892 = vmatmul.msk.bf16.vlgmr.msra.gmra.mxu3 %vm162_vm0, %v549_v51 }
 0x12e   :  { %v272_v10 = vpop.f32.mrf.mxu0  ;;  %v490_v55 = vpop.f32.mrf.mxu3 }
 0x12f   :  { %v538_v11 = vpack.c.bf16 %v508_v9, %v507_v7  ;;  %v273_v12 = vadd.f32 %v1070_v18, %v272_v10  ;;  %v491_v60 = vadd.f32 %v1132_v52, %v490_v55 }
 0x131   :  { %v321_v14 = vmax.f32 %v273_v12, 0.0  ;;  %881 = vmatmul.msk.bf16.gmra.mxu2 %vm162_vm0, %v538_v11  ;;  %v531_v63 = vmax.f32 %v491_v60, 0.0 }
 0x132   :  { %v435_v15 = vpop.f32.mrf.mxu1 }
 0x133   :  { %v342_v16 = vpack.c.bf16 %v321_v14, %v320_v13  ;;  %v436_v19 = vadd.f32 %v1132_v52, %v435_v15 }
 0x135   :  { %866 = vmatmul.msk.bf16.gmra.mxu1 %vm162_vm0, %v342_v16  ;;  %v509_v22 = vmax.f32 %v436_v19, 0.0 }
 0x136   :  { %v275_v17 = vpop.f32.mrf.mxu0  ;;  %v492_v62 = vpop.f32.mrf.mxu3 }
 0x137   :  { %v276_v23 = vadd.f32 %v1070_v18, %v275_v17  ;;  %v493_v0 = vadd.f32 %v1132_v52, %v492_v62 }
 0x139   :  { %v322_v28 = vmax.f32 %v276_v23, 0.0  ;;  %v532_v1 = vmax.f32 %v493_v0, 0.0 }
 0x13a   :  { %v437_v20 = vpop.f32.mrf.mxu1 }
 0x13b   :  { %v438_v21 = vadd.f32 %v1132_v52, %v437_v20  ;;  %v550_v2 = vpack.c.bf16 %v532_v1, %v531_v63 }
 0x13d   :  { %v510_v24 = vmax.f32 %v438_v21, 0.0  ;;  %893 = vmatmul.msk.bf16.gmra.mxu3 %vm162_vm0, %v550_v2 }
 0x13e   :  { %v277_v25 = vpop.f32.mrf.mxu0  ;;  %v495_v5 = vpop.f32.mrf.mxu3 }
 0x13f   :  { %v539_v26 = vpack.c.bf16 %v510_v24, %v509_v22  ;;  %v278_v27 = vadd.f32 %v1070_v18, %v277_v25  ;;  %v496_v10 = vadd.f32 %v1132_v52, %v495_v5 }
 0x141   :  { %v323_v29 = vmax.f32 %v278_v27, 0.0  ;;  %882 = vmatmul.msk.bf16.gmra.mxu2 %vm162_vm0, %v539_v26  ;;  %v533_v13 = vmax.f32 %v496_v10, 0.0 }
 0x142   :  { %v440_v30 = vpop.f32.mrf.mxu1 }
 0x143   :  { %v343_v31 = vpack.c.bf16 %v323_v29, %v322_v28  ;;  %v441_v32 = vadd.f32 %v1132_v52, %v440_v30 }
 0x145   :  { %867 = vmatmul.msk.bf16.gmra.mxu1 %vm162_vm0, %v343_v31  ;;  %v511_v35 = vmax.f32 %v441_v32, 0.0 }
 0x146   :  { %v497_v12 = vpop.f32.mrf.mxu3 }
 0x147   :  { %v498_v14 = vadd.f32 %v1132_v52, %v497_v12 }
 0x149   :  { %v534_v15 = vmax.f32 %v498_v14, 0.0 }
 0x14a   :  { %v442_v33 = vpop.f32.mrf.mxu1 }
 0x14b   :  { %v443_v34 = vadd.f32 %v1132_v52, %v442_v33  ;;  %v551_v16 = vpack.c.bf16 %v534_v15, %v533_v13 }
 0x14d   :  { %v512_v36 = vmax.f32 %v443_v34, 0.0  ;;  %894 = vmatmul.msk.bf16.gmra.mxu3 %vm162_vm0, %v551_v16 }
 0x14e   :  { %v500_v20 = vpop.f32.mrf.mxu3 }
 0x14f   :  { %v540_v37 = vpack.c.bf16 %v512_v36, %v511_v35  ;;  %v501_v25 = vadd.f32 %v1132_v52, %v500_v20 }
 0x151   :  { %883 = vmatmul.msk.bf16.gmra.mxu2 %vm162_vm0, %v540_v37  ;;  %v535_v28 = vmax.f32 %v501_v25, 0.0 }
 0x152   :  { %v445_v38 = vpop.f32.mrf.mxu1 }
 0x153   :  { %v446_v18 = vadd.f32 %v1132_v52, %v445_v38  ;;  %v1186_v38 = vld [vmem:[%s1239_s7] ss:$0 sm:$0xff]  ;;  %s956_s7 = smov [#allocation4]  }
 0x154   :  { %s746_s0 = sshll.u32 %s956_s7, 4  ;;  %s747_s0 = int_to_ptr.vmem [resolvable:$true] %s746_s0 }
 0x155   :  { %v513_v42 = vmax.f32 %v446_v18, 0.0 }
 0x156   :  { %v502_v27 = vpop.f32.mrf.mxu3 }
 0x157   :  { %v503_v29 = vadd.f32 %v1132_v52, %v502_v27 }
 0x159   :  { %v536_v30 = vmax.f32 %v503_v29, 0.0 }
 0x15a   :  { %v447_v39 = vpop.f32.mrf.mxu1 }
 0x15b   :  { %v448_v41 = vadd.f32 %v1132_v52, %v447_v39  ;;  %v552_v31 = vpack.c.bf16 %v536_v30, %v535_v28 }
 0x15d   :  { %v514_v43 = vmax.f32 %v448_v41, 0.0  ;;  %895 = vmatmul.msk.bf16.gmra.mxu3 %vm162_vm0, %v552_v31 }
 0x15f   :  { %v541_v44 = vpack.c.bf16 %v514_v43, %v513_v42 }
 0x161   :  { %884 = vmatmul.msk.bf16.gmra.mxu2 %vm162_vm0, %v541_v44 }
 0x162   :  { %v450_v46 = vpop.f32.mrf.mxu1 }
 0x163   :  { %v451_v53 = vadd.f32 %v1132_v52, %v450_v46 }
 0x165   :  { %v515_v57 = vmax.f32 %v451_v53, 0.0 }
 0x16a   :  { %v452_v54 = vpop.f32.mrf.mxu1 }
 0x16b   :  { %v453_v56 = vadd.f32 %v1132_v52, %v452_v54 }
 0x16d   :  { %v516_v58 = vmax.f32 %v453_v56, 0.0 }
 0x16f   :  { %v542_v59 = vpack.c.bf16 %v516_v58, %v515_v57 }
 0x171   :  { %885 = vmatmul.msk.bf16.gmra.mxu2 %vm162_vm0, %v542_v59 }
 0x172   :  { %v455_v61 = vpop.f32.mrf.mxu1 }
 0x173   :  { %v456_v3 = vadd.f32 %v1132_v52, %v455_v61 }
 0x175   :  { %v517_v7 = vmax.f32 %v456_v3, 0.0 }
 0x17a   :  { %v457_v4 = vpop.f32.mrf.mxu1 }
 0x17b   :  { %v458_v6 = vadd.f32 %v1132_v52, %v457_v4 }
 0x17d   :  { %v518_v8 = vmax.f32 %v458_v6, 0.0 }
 0x17f   :  { %v543_v9 = vpack.c.bf16 %v518_v8, %v517_v7 }
 0x181   :  { %886 = vmatmul.msk.bf16.gmra.mxu2 %vm162_vm0, %v543_v9 }
 0x182   :  { %v460_v11 = vpop.f32.mrf.mxu1 }
 0x183   :  { %v461_v17 = vadd.f32 %v1132_v52, %v460_v11 }
 0x185   :  { %v519_v22 = vmax.f32 %v461_v17, 0.0 }
 0x18a   :  { %v462_v19 = vpop.f32.mrf.mxu1 }
 0x18b   :  { %v463_v21 = vadd.f32 %v1132_v52, %v462_v19 }
 0x18d   :  { %v520_v23 = vmax.f32 %v463_v21, 0.0 }
 0x18f   :  { %v544_v24 = vpack.c.bf16 %v520_v23, %v519_v22 }
 0x191   :  { %887 = vmatmul.msk.bf16.gmra.mxu2 %vm162_vm0, %v544_v24 }
 0x192   :  { %v465_v26 = vpop.f32.mrf.mxu1 }
 0x193   :  { %v466_v32 = vadd.f32 %v1132_v52, %v465_v26 }
 0x195   :  { %v521_v35 = vmax.f32 %v466_v32, 0.0 }
 0x19a   :  { %v467_v33 = vpop.f32.mrf.mxu1 }
 0x19b   :  { %v468_v34 = vadd.f32 %v1132_v52, %v467_v33 }
 0x19d   :  { %v522_v36 = vmax.f32 %v468_v34, 0.0 }
 0x19f   :  { %v545_v37 = vpack.c.bf16 %v522_v36, %v521_v35 }
 0x1a1   :  { %888 = vmatmul.msk.bf16.gmra.mxu2 %vm162_vm0, %v545_v37 }
 0x1a2   :  { %v470_v18 = vpop.f32.mrf.mxu1 }
 0x1a3   :  { %v471_v41 = vadd.f32 %v1132_v52, %v470_v18 }
 0x1a4   :  { %v630_v39 = vpop.f32.mrf.mxu2 }
 0x1a5   :  { %v631_v40 = vadd.f32 %v1186_v38, %v630_v39  ;;  %v523_v45 = vmax.f32 %v471_v41, 0.0 }
 0x1a7   :  { %710 = vst [vmem:[#allocation4] sm:$0xff] %v631_v40 }
 0x1aa   :  { %v472_v42 = vpop.f32.mrf.mxu1 }
 0x1ab   :  { %v473_v43 = vadd.f32 %v1132_v52, %v472_v42 }
 0x1ac   :  { %v632_v44 = vpop.f32.mrf.mxu2 }
 0x1ad   :  { %v524_v46 = vmax.f32 %v473_v43, 0.0  ;;  %v633_v47 = vadd.f32 %v1186_v38, %v632_v44 }
 0x1af   :  { %v546_v48 = vpack.c.bf16 %v524_v46, %v523_v45  ;;  %711 = vst [vmem:[#allocation4 + $0x8] sm:$0xff] %v633_v47 }
 0x1b0   :  { %v690_v14 = vpop.f32.mrf.mxu3 }
 0x1b1   :  { %889 = vmatmul.msk.bf16.gmra.mxu2 %vm162_vm0, %v546_v48  ;;  %v691_v16 = vadd.f32 %v1186_v38, %v690_v14 }
 0x1b2   :  { %v475_v49 = vpop.f32.mrf.mxu1 }
 0x1b3   :  { %v476_v53 = vadd.f32 %v1132_v52, %v475_v49  ;;  %734 = vst [vmem:[#allocation4 + $0xc0] sm:$0xff] %v691_v16 }
 0x1b4   :  { %v635_v50 = vpop.f32.mrf.mxu2 }
 0x1b5   :  { %v636_v51 = vadd.f32 %v1186_v38, %v635_v50  ;;  %v525_v57 = vmax.f32 %v476_v53, 0.0 }
 0x1b7   :  { %712 = vst [vmem:[#allocation4 + $0x10] sm:$0xff] %v636_v51 }
 0x1b8   :  { %v692_v19 = vpop.f32.mrf.mxu3 }
 0x1b9   :  { %v693_v21 = vadd.f32 %v1186_v38, %v692_v19 }
 0x1ba   :  { %v477_v54 = vpop.f32.mrf.mxu1 }
 0x1bb   :  { %v478_v55 = vadd.f32 %v1132_v52, %v477_v54  ;;  %735 = vst [vmem:[#allocation4 + $0xc8] sm:$0xff] %v693_v21 }
 0x1bc   :  { %v637_v56 = vpop.f32.mrf.mxu2 }
 0x1bd   :  { %v526_v58 = vmax.f32 %v478_v55, 0.0  ;;  %v638_v59 = vadd.f32 %v1186_v38, %v637_v56 }
 0x1bf   :  { %v547_v60 = vpack.c.bf16 %v526_v58, %v525_v57  ;;  %713 = vst [vmem:[#allocation4 + $0x18] sm:$0xff] %v638_v59 }
 0x1c0   :  { %v695_v23 = vpop.f32.mrf.mxu3 }
 0x1c1   :  { %890 = vmatmul.msk.bf16.gmra.mxu2 %vm162_vm0, %v547_v60  ;;  %v696_v25 = vadd.f32 %v1186_v38, %v695_v23 }
 0x1c2   :  { %v480_v61 = vpop.f32.mrf.mxu1 }
 0x1c3   :  { %v481_v0 = vadd.f32 %v1132_v52, %v480_v61  ;;  %736 = vst [vmem:[#allocation4 + $0xd0] sm:$0xff] %v696_v25 }
 0x1c4   :  { %v640_v62 = vpop.f32.mrf.mxu2 }
 0x1c5   :  { %v641_v63 = vadd.f32 %v1186_v38, %v640_v62  ;;  %v527_v4 = vmax.f32 %v481_v0, 0.0 }
 0x1c7   :  { %714 = vst [vmem:[#allocation4 + $0x20] sm:$0xff] %v641_v63 }
 0x1c8   :  { %v697_v27 = vpop.f32.mrf.mxu3 }
 0x1c9   :  { %v698_v29 = vadd.f32 %v1186_v38, %v697_v27 }
 0x1ca   :  { %v482_v1 = vpop.f32.mrf.mxu1 }
 0x1cb   :  { %v483_v2 = vadd.f32 %v1132_v52, %v482_v1  ;;  %737 = vst [vmem:[#allocation4 + $0xd8] sm:$0xff] %v698_v29 }
 0x1cc   :  { %v642_v3 = vpop.f32.mrf.mxu2 }
 0x1cd   :  { %v528_v5 = vmax.f32 %v483_v2, 0.0  ;;  %v643_v6 = vadd.f32 %v1186_v38, %v642_v3 }
 0x1cf   :  { %v548_v7 = vpack.c.bf16 %v528_v5, %v527_v4  ;;  %715 = vst [vmem:[#allocation4 + $0x28] sm:$0xff] %v643_v6 }
 0x1d0   :  { %v700_v31 = vpop.f32.mrf.mxu3 }
 0x1d1   :  { %891 = vmatmul.msk.bf16.gmra.mxu2 %vm162_vm0, %v548_v7  ;;  %v701_v33 = vadd.f32 %v1186_v38, %v700_v31 }
 0x1d3   :  { %738 = vst [vmem:[#allocation4 + $0xe0] sm:$0xff] %v701_v33 }
 0x1d4   :  { %v645_v8 = vpop.f32.mrf.mxu2 }
 0x1d5   :  { %v646_v9 = vadd.f32 %v1186_v38, %v645_v8 }
 0x1d7   :  { %716 = vst [vmem:[#allocation4 + $0x30] sm:$0xff] %v646_v9 }
 0x1d8   :  { %v702_v35 = vpop.f32.mrf.mxu3 }
 0x1d9   :  { %v703_v37 = vadd.f32 %v1186_v38, %v702_v35 }
 0x1db   :  { %739 = vst [vmem:[#allocation4 + $0xe8] sm:$0xff] %v703_v37 }
 0x1dc   :  { %v647_v10 = vpop.f32.mrf.mxu2 }
 0x1dd   :  { %v648_v11 = vadd.f32 %v1186_v38, %v647_v10 }
 0x1df   :  { %717 = vst [vmem:[#allocation4 + $0x38] sm:$0xff] %v648_v11 }
 0x1e0   :  { %v705_v39 = vpop.f32.mrf.mxu3 }
 0x1e1   :  { %v706_v41 = vadd.f32 %v1186_v38, %v705_v39 }
 0x1e3   :  { %740 = vst [vmem:[#allocation4 + $0xf0] sm:$0xff] %v706_v41 }
 0x1e4   :  { %v650_v12 = vpop.f32.mrf.mxu2 }
 0x1e5   :  { %v651_v52 = vadd.f32 %v1186_v38, %v650_v12 }
 0x1e7   :  { %718 = vst [vmem:[#allocation4 + $0x40] sm:$0xff] %v651_v52 }
 0x1e8   :  { %v707_v43 = vpop.f32.mrf.mxu3 }
 0x1e9   :  { %v708_v45 = vadd.f32 %v1186_v38, %v707_v43 }
 0x1eb   :  { %741 = vst [vmem:[#allocation4 + $0xf8] sm:$0xff] %v708_v45 }
 0x1ec   :  { %v652_v13 = vpop.f32.mrf.mxu2 }
 0x1ed   :  { %v653_v15 = vadd.f32 %v1186_v38, %v652_v13 }
 0x1ef   :  { %719 = vst [vmem:[#allocation4 + $0x48] sm:$0xff] %v653_v15 }
 0x1f4   :  { %v655_v17 = vpop.f32.mrf.mxu2 }
 0x1f5   :  { %v656_v20 = vadd.f32 %v1186_v38, %v655_v17 }
 0x1f7   :  { %720 = vst [vmem:[#allocation4 + $0x50] sm:$0xff] %v656_v20 }
 0x1fc   :  { %v657_v22 = vpop.f32.mrf.mxu2 }
 0x1fd   :  { %v658_v24 = vadd.f32 %v1186_v38, %v657_v22 }
 0x1ff   :  { %721 = vst [vmem:[#allocation4 + $0x58] sm:$0xff] %v658_v24 }
 0x204   :  { %v660_v26 = vpop.f32.mrf.mxu2 }
 0x205   :  { %v661_v28 = vadd.f32 %v1186_v38, %v660_v26 }
 0x207   :  { %722 = vst [vmem:[#allocation4 + $0x60] sm:$0xff] %v661_v28 }
 0x20c   :  { %v662_v30 = vpop.f32.mrf.mxu2 }
 0x20d   :  { %v663_v32 = vadd.f32 %v1186_v38, %v662_v30 }
 0x20f   :  { %723 = vst [vmem:[#allocation4 + $0x68] sm:$0xff] %v663_v32 }
 0x214   :  { %v665_v34 = vpop.f32.mrf.mxu2 }
 0x215   :  { %v666_v36 = vadd.f32 %v1186_v38, %v665_v34 }
 0x217   :  { %724 = vst [vmem:[#allocation4 + $0x70] sm:$0xff] %v666_v36 }
 0x21c   :  { %v667_v18 = vpop.f32.mrf.mxu2 }
 0x21d   :  { %v668_v40 = vadd.f32 %v1186_v38, %v667_v18 }
 0x21f   :  { %725 = vst [vmem:[#allocation4 + $0x78] sm:$0xff] %v668_v40 }
 0x224   :  { %v670_v42 = vpop.f32.mrf.mxu2 }
 0x225   :  { %v671_v44 = vadd.f32 %v1186_v38, %v670_v42 }
 0x227   :  { %726 = vst [vmem:[#allocation4 + $0x80] sm:$0xff] %v671_v44 }
 0x22c   :  { %v672_v46 = vpop.f32.mrf.mxu2 }
 0x22d   :  { %v673_v47 = vadd.f32 %v1186_v38, %v672_v46 }
 0x22f   :  { %727 = vst [vmem:[#allocation4 + $0x88] sm:$0xff] %v673_v47 }
 0x234   :  { %v675_v48 = vpop.f32.mrf.mxu2 }
 0x235   :  { %v676_v49 = vadd.f32 %v1186_v38, %v675_v48 }
 0x237   :  { %728 = vst [vmem:[#allocation4 + $0x90] sm:$0xff] %v676_v49 }
 0x23c   :  { %v677_v50 = vpop.f32.mrf.mxu2 }
 0x23d   :  { %v678_v51 = vadd.f32 %v1186_v38, %v677_v50 }
 0x23f   :  { %729 = vst [vmem:[#allocation4 + $0x98] sm:$0xff] %v678_v51 }
 0x244   :  { %v680_v53 = vpop.f32.mrf.mxu2 }
 0x245   :  { %v681_v54 = vadd.f32 %v1186_v38, %v680_v53 }
 0x247   :  { %730 = vst [vmem:[#allocation4 + $0xa0] sm:$0xff] %v681_v54 }
 0x24c   :  { %v682_v55 = vpop.f32.mrf.mxu2 }
 0x24d   :  { %v683_v56 = vadd.f32 %v1186_v38, %v682_v55 }
 0x24f   :  { %731 = vst [vmem:[#allocation4 + $0xa8] sm:$0xff] %v683_v56 }
 0x254   :  { %v685_v57 = vpop.f32.mrf.mxu2 }
 0x255   :  { %v686_v58 = vadd.f32 %v1186_v38, %v685_v57 }
 0x257   :  { %732 = vst [vmem:[#allocation4 + $0xb0] sm:$0xff] %v686_v58 }
 0x25c   :  { %v687_v59 = vpop.f32.mrf.mxu2 }
 0x25d   :  { %v688_v60 = vadd.f32 %v1186_v38, %v687_v59 }
 0x25f   :  { %733 = vst [vmem:[#allocation4 + $0xb8] sm:$0xff] %v688_v60 }
 0x260   :  { %754 = dma.vmem_to_hbm [thread:$0]  %s747_s0, 4096, %s749_s26, [#allocation5], %s957_s27, %s957_s27, %s958_s28  }
 0x261   :  { %954 = dma.done.wait [#allocation5], 4096  }
 0x262   :  { %955 = vsyncadd [#allocation5], 4294963200 }
 0x263   :  { %759 = vsyncpa [#allocation5], 1 }

</bundles_post_ra>
